<compile_context>
chip_gen: v6e
topology: v6e:2x2x1
jax: 0.10.0
libtpu: 0.0.40
codegen_flags: <defaults>
</compile_context>

<pallas_src>
import functools
import math

import jax
import jax.numpy as jnp
from jax import lax
from jax.experimental import pallas as pl
from jax.experimental.pallas import tpu as pltpu


def _pick_tile(dim, preferred, lane=False):
    """Largest tile <= preferred that divides dim (lane dims must be %128)."""
    if lane:
        candidates = (preferred, 1024, 512, 256, 128)
    else:
        candidates = (preferred, 512, 256, 128, 64, 32, 16, 8)
    for cand in candidates:
        if cand <= dim and dim % cand == 0 and (not lane or cand % 128 == 0):
            return cand
    return dim  # fall back to the full (untiled) dimension


def _apply_dropout(p, dropout_p, seed_offset):
    """Inverted dropout on the pre-normalized weights tile."""
    pltpu.prng_seed(seed_offset)
    bits = pltpu.bitcast(pltpu.prng_random_bits(p.shape), jnp.uint32)
    threshold = jnp.uint32(min(int(dropout_p * 4294967296.0), 4294967295))
    keep = bits >= threshold
    return jnp.where(keep, p * (1.0 / (1.0 - dropout_p)), 0.0)


def _scores_tile(q, k, s_ref, b_ref, scale, has_scale_t, has_bias):
    """(tq, tk) f32 scores for the current tile."""
    if not has_scale_t:
        # Fold the scalar scale into the small (tq, E1) query tile instead of
        # the big (tq, tk) scores tile.
        q = q * scale
    # QK^T without an explicit transpose: contract on E1 of both operands.
    scores = lax.dot_general(
        q, k, dimension_numbers=(((1,), (1,)), ((), ())),
        preferred_element_type=jnp.float32)
    if has_scale_t:
        scores = scores * s_ref[0].astype(jnp.float32)   # broadcasts in-kernel
    if has_bias:
        scores = scores + b_ref[0].astype(jnp.float32)   # broadcasts in-kernel
    return scores


def _flash_attention_kernel(*refs, has_scale_t, has_bias, scale, dropout_p,
                            training, seed):
    """Multi-k-block path (online softmax with VMEM scratch accumulators).

    refs: q (1,tq,E1), k (1,tk,E1), v (1,tk,E2), [scale tile], [bias tile],
          out (1,tq,E2),
          scratch: acc (tq,E2) f32, m (tq,1) f32, l (tq,1) f32
    """
    it = iter(refs)
    q_ref = next(it)
    k_ref = next(it)
    v_ref = next(it)
    s_ref = next(it) if has_scale_t else None
    b_ref = next(it) if has_bias else None
    o_ref = next(it)
    acc_ref = next(it)
    m_ref = next(it)
    l_ref = next(it)

    ki = pl.program_id(2)
    nk = pl.num_programs(2)

    @pl.when(ki == 0)
    def _():
        m_ref[...] = jnp.full_like(m_ref, -jnp.inf)
        l_ref[...] = jnp.zeros_like(l_ref)
        acc_ref[...] = jnp.zeros_like(acc_ref)

    q = q_ref[0]                       # (tq, E1), native dtype
    k = k_ref[0]                       # (tk, E1), native dtype
    v = v_ref[0]                       # (tk, E2), native dtype

    scores = _scores_tile(q, k, s_ref, b_ref, scale, has_scale_t, has_bias)

    # ---- online softmax ----
    m_prev = m_ref[...]                                          # (tq, 1)
    m_new = jnp.maximum(m_prev, jnp.max(scores, axis=-1, keepdims=True))
    alpha = jnp.exp(m_prev - m_new)                              # (tq, 1)
    p = jnp.exp(scores - m_new)                                  # (tq, tk)

    # Denominator accumulates from the *pre-dropout* weights, so the final
    # division reproduces dropout(softmax(scores)) @ V exactly.
    l_ref[...] = alpha * l_ref[...] + jnp.sum(p, axis=-1, keepdims=True)
    m_ref[...] = m_new

    if training and dropout_p > 0.0:
        b_idx = pl.program_id(0)
        qi = pl.program_id(1)
        nq = pl.num_programs(1)
        p = _apply_dropout(p, dropout_p, seed + (b_idx * nq + qi) * nk + ki)

    pv = lax.dot_general(
        p.astype(v.dtype), v, dimension_numbers=(((1,), (0,)), ((), ())),
        preferred_element_type=jnp.float32)                      # (tq, E2)
    acc_ref[...] = alpha * acc_ref[...] + pv

    @pl.when(ki == nk - 1)
    def _():
        l_val = l_ref[...]
        inv_l = pl.reciprocal(l_val, approx=True)        # EUP vrcp (free slot)
        inv_l = inv_l * (2.0 - l_val * inv_l)            # Newton step on (tq,1)
        o_ref[0] = (acc_ref[...] * inv_l).astype(o_ref.dtype)


def _single_block_kernel(*refs, has_scale_t, has_bias, scale, dropout_p,
                         training, seed):
    """Fast path: the whole S2 fits in a single k-block (no scratch, no
    online-softmax rescaling)."""
    it = iter(refs)
    q_ref = next(it)
    k_ref = next(it)
    v_ref = next(it)
    s_ref = next(it) if has_scale_t else None
    b_ref = next(it) if has_bias else None
    o_ref = next(it)

    q = q_ref[0]
    k = k_ref[0]
    v = v_ref[0]

    scores = _scores_tile(q, k, s_ref, b_ref, scale, has_scale_t, has_bias)

    m = jnp.max(scores, axis=-1, keepdims=True)                  # (tq, 1)
    p = jnp.exp(scores - m)                                      # (tq, S2)
    l = jnp.sum(p, axis=-1, keepdims=True)                       # (tq, 1)

    if training and dropout_p > 0.0:
        b_idx = pl.program_id(0)
        qi = pl.program_id(1)
        nq = pl.num_programs(1)
        p = _apply_dropout(p, dropout_p, seed + b_idx * nq + qi)

    pv = lax.dot_general(
        p.astype(v.dtype), v, dimension_numbers=(((1,), (0,)), ((), ())),
        preferred_element_type=jnp.float32)                      # (tq, E2)

    inv_l = pl.reciprocal(l, approx=True)
    inv_l = inv_l * (2.0 - l * inv_l)
    # Normalize the (tq, E2) output tile (cheaper than normalizing (tq, S2) p).
    o_ref[0] = (pv * inv_l).astype(o_ref.dtype)


def _make_bcast_spec(arr, B, S1, S2, tq, tk):
    """BlockSpec for a bias/scale array broadcastable to (B, S1, S2) that
    streams it in its original (possibly size-1) shape instead of
    materializing the dense broadcast in HBM."""
    a = jnp.asarray(arr)
    while a.ndim > 3:
        assert a.shape[0] == 1, "scale/bias must be broadcastable to (B,S1,S2)"
        a = jnp.squeeze(a, axis=0)
    while a.ndim < 3:
        a = a[None]
    d0, d1, d2 = a.shape
    assert d0 in (1, B) and d1 in (1, S1) and d2 in (1, S2), \
        "scale/bias must be broadcastable to (B, S1, S2)"

    b1 = tq if d1 == S1 else 1
    b2 = tk if d2 == S2 else 1

    def index_map(b, qi, ki):
        return (b if d0 == B else 0,
                qi if d1 == S1 else 0,
                ki if d2 == S2 else 0)

    spec = pl.BlockSpec((1, b1, b2), index_map)
    block_bytes = b1 * b2 * jnp.dtype(a.dtype).itemsize
    return a, spec, block_bytes


def dot_product_attention(query, key, value, scale=None, bias=None, *,
                          dropout_p=0.0, training=False, seed=0,
                          block_q=128, block_k=256):
    """Pallas implementation of DotProductAttention.forward.

    query: (B, S1, E1), key: (B, S2, E1), value: (B, S2, E2)
    scale: None, python float / 0-d array, or array broadcastable to (B,S1,S2)
    bias:  optional array broadcastable to (B, S1, S2)
    returns (B, S1, E2)
    """
    B, S1, E1 = query.shape
    Bk, S2, E1k = key.shape
    Bv, S2v, E2 = value.shape
    assert B == Bk == Bv and E1 == E1k and S2 == S2v

    # Scalar scale is folded into q inside the kernel; tensor scale is streamed
    # per-tile (in its original broadcast shape) like bias.
    has_scale_t = False
    scale_val = 1.0 / math.sqrt(E1)
    if scale is not None:
        if isinstance(scale, (int, float)) or getattr(scale, "ndim", 1) == 0:
            scale_val = float(scale)
        else:
            has_scale_t = True

    has_bias = bias is not None

    tq = _pick_tile(S1, block_q)
    # tk shows up as the lane (last) dim of the bias/scale tiles, so keep it a
    # multiple of 128 (or the full S2).
    tk = _pick_tile(S2, block_k, lane=True)
    nk = S2 // tk
    grid = (B, S1 // tq, nk)

    in_specs = [
        pl.BlockSpec((1, tq, E1), lambda b, qi, ki: (b, qi, 0)),
        pl.BlockSpec((1, tk, E1), lambda b, qi, ki: (b, ki, 0)),
        pl.BlockSpec((1, tk, E2), lambda b, qi, ki: (b, ki, 0)),
    ]
    inputs = [query, key, value]
    extra_block_bytes = 0
    if has_scale_t:
        sarr, sspec, sbytes = _make_bcast_spec(scale, B, S1, S2, tq, tk)
        in_specs.append(sspec)
        inputs.append(sarr)
        extra_block_bytes += sbytes
    if has_bias:
        barr, bspec, bbytes = _make_bcast_spec(bias, B, S1, S2, tq, tk)
        in_specs.append(bspec)
        inputs.append(barr)
        extra_block_bytes += bbytes

    single_k = (nk == 1)
    kernel_fn = _single_block_kernel if single_k else _flash_attention_kernel
    kernel = functools.partial(
        kernel_fn,
        has_scale_t=has_scale_t,
        has_bias=has_bias,
        scale=scale_val,
        dropout_p=float(dropout_p),
        training=bool(training),
        seed=int(seed),
    )

    scratch_shapes = []
    if not single_k:
        scratch_shapes = [
            pltpu.VMEM((tq, E2), jnp.float32),   # output accumulator
            pltpu.VMEM((tq, 1), jnp.float32),    # running max
            pltpu.VMEM((tq, 1), jnp.float32),    # running denom
        ]

    # VMEM budget estimate (double-buffered input tiles + output + scratch +
    # scores intermediate), with headroom; capped so it still fits v7x's
    # 64 MiB physical VMEM.
    q_isz = jnp.dtype(query.dtype).itemsize
    kv_isz = jnp.dtype(value.dtype).itemsize
    tile_bytes = 2 * (tq * E1 * q_isz + tk * E1 * kv_isz + tk * E2 * kv_isz)
    tile_bytes += 2 * extra_block_bytes
    tile_bytes += 2 * tq * E2 * q_isz               # output buffers
    tile_bytes += (tq * E2 + 2 * tq) * 4            # f32 scratch
    tile_bytes += 4 * tq * tk                       # scores/weights intermediate
    vmem_limit = min(max(int(tile_bytes * 1.5) + (4 << 20), 16 << 20), 48 << 20)

    return pl.pallas_call(
        kernel,
        out_shape=jax.ShapeDtypeStruct((B, S1, E2), query.dtype),
        grid_spec=pltpu.PrefetchScalarGridSpec(
            num_scalar_prefetch=0,
            grid=grid,
            in_specs=in_specs,
            out_specs=pl.BlockSpec((1, tq, E2), lambda b, qi, ki: (b, qi, 0)),
            scratch_shapes=scratch_shapes,
        ),
        compiler_params=pltpu.CompilerParams(
            dimension_semantics=("parallel", "parallel", "arbitrary"),
            vmem_limit_bytes=vmem_limit,
        ),
    )(*inputs)


def _reference(query, key, value, scale=None, bias=None):
    """Pure-JAX reference replicating the PyTorch forward (eval mode)."""
    if scale is None:
        scale = 1.0 / math.sqrt(key.shape[-1])
    scores = jnp.einsum("bse,bte->bst", query, key) * scale
    if bias is not None:
        scores = scores + bias
    weights = jax.nn.softmax(scores, axis=-1)
    return jnp.einsum("bst,bte->bse", weights, value)


if __name__ == "__main__":
    # Small shapes that still exercise the tiled paths: 2 reduction (S2) steps
    # for the flash path, lane-dense E2=128 output block.
    B, S1, S2, E1, E2 = 2, 128, 256, 64, 128
    rng = jax.random.PRNGKey(0)
    kq, kk, kv, kb = jax.random.split(rng, 4)

    q = jax.random.normal(kq, (B, S1, E1), dtype=jnp.float32)
    k = jax.random.normal(kk, (B, S2, E1), dtype=jnp.float32)
    v = jax.random.normal(kv, (B, S2, E2), dtype=jnp.float32)
    bias = 0.1 * jax.random.normal(kb, (B, S1, S2), dtype=jnp.float32)

    # dropout_p from __init__; run in eval mode so dropout is the identity
    # (matching module.eval() / deterministic forward).
    # TODO(synk): training-mode dropout uses the TPU hardware PRNG, so the
    # exact dropped positions differ from torch's RNG stream (same statistics).

    # 1) Multi-k-block (flash) path with a dense (B, S1, S2) bias.
    out = dot_product_attention(q, k, v, scale=None, bias=bias,
                                dropout_p=0.1, training=False, block_k=128)
    out = jax.block_until_ready(out)
    ref = _reference(q, k, v, scale=None, bias=bias)
    assert out.shape == (B, S1, E2)
    assert jnp.max(jnp.abs(out - ref)) < 2e-3, "mismatch vs reference (bias)"

    # 2) Single-k-block fast path (default block_k=256 == S2), no bias.
    out_nb = jax.block_until_ready(
        dot_product_attention(q, k, v, dropout_p=0.1, training=False))
    ref_nb = _reference(q, k, v)
    assert jnp.max(jnp.abs(out_nb - ref_nb)) < 2e-3, "mismatch vs reference"

    # 3) Broadcast-shaped bias (B, 1, S2) + tensor scale (B, 1, 1): streamed
    #    without materializing the dense (B, S1, S2) broadcast in HBM.
    bias_b = 0.1 * jax.random.normal(kb, (B, 1, S2), dtype=jnp.float32)
    scale_t = jnp.full((B, 1, 1), 0.2, dtype=jnp.float32)
    out_sc = jax.block_until_ready(
        dot_product_attention(q, k, v, scale=scale_t, bias=bias_b,
                              dropout_p=0.1, training=False, block_k=128))
    ref_sc = _reference(q, k, v, scale=scale_t, bias=bias_b)
    assert jnp.max(jnp.abs(out_sc - ref_sc)) < 2e-3, "mismatch vs reference (scale)"

    print("KERNEL_OK")
</pallas_src>

<mosaic_0001>
module attributes {stable_mosaic.version = 11 : i64} {
  func.func @_flash_attention_kernel(%arg0: i32, %arg1: i32, %arg2: i32, %arg3: memref<1x128x64xf32, #tpu.memory_space<vmem>>, %arg4: memref<1x128x64xf32, #tpu.memory_space<vmem>>, %arg5: memref<1x128x128xf32, #tpu.memory_space<vmem>>, %arg6: memref<1x128x128xf32, #tpu.memory_space<vmem>>, %arg7: memref<1x128x128xf32, #tpu.memory_space<vmem>>, %arg8: memref<128x128xf32, #tpu.memory_space<vmem>>, %arg9: memref<128x1xf32, #tpu.memory_space<vmem>>, %arg10: memref<128x1xf32, #tpu.memory_space<vmem>>) attributes {dimension_semantics = [#tpu.dimension_semantics<parallel>, #tpu.dimension_semantics<parallel>, #tpu.dimension_semantics<arbitrary>], iteration_bounds = array<i64: 2, 1, 2>, scalar_prefetch = 0 : i64, scratch_operands = 3 : i64, tpu.core_type = #tpu.core_type<tc>, window_params = [{transform_indices = @transform_0, window_bounds = array<i64: 1, 128, 64>}, {transform_indices = @transform_1, window_bounds = array<i64: 1, 128, 64>}, {transform_indices = @transform_2, window_bounds = array<i64: 1, 128, 128>}, {transform_indices = @transform_3, window_bounds = array<i64: 1, 128, 128>}, {transform_indices = @transform_4, window_bounds = array<i64: 1, 128, 128>}]} {
    %c0_i32 = arith.constant 0 : i32
    %0 = arith.cmpi eq, %arg2, %c0_i32 : i32
    %1 = arith.extui %0 : i1 to i32
    %c0_i32_0 = arith.constant 0 : i32
    %2 = arith.cmpi ne, %1, %c0_i32_0 : i32
    scf.if %2 {
      %cst_29 = arith.constant 0xFF800000 : f32
      %40 = vector.broadcast %cst_29 : f32 to vector<128x1xf32>
      %c0_30 = arith.constant 0 : index
      %c0_31 = arith.constant 0 : index
      %41 = vector.load %arg9[%c0_30, %c0_31] : memref<128x1xf32, #tpu.memory_space<vmem>>, vector<128x1xf32>
      tpu.vector_store %arg9[%c0_30, %c0_31], %40 {strides = array<i32>} : memref<128x1xf32, #tpu.memory_space<vmem>>, vector<128x1xf32>,
      %cst_32 = arith.constant 0.000000e+00 : f32
      %42 = vector.broadcast %cst_32 : f32 to vector<128x1xf32>
      %c0_33 = arith.constant 0 : index
      %c0_34 = arith.constant 0 : index
      %43 = vector.load %arg10[%c0_33, %c0_34] : memref<128x1xf32, #tpu.memory_space<vmem>>, vector<128x1xf32>
      tpu.vector_store %arg10[%c0_33, %c0_34], %42 {strides = array<i32>} : memref<128x1xf32, #tpu.memory_space<vmem>>, vector<128x1xf32>,
      %cst_35 = arith.constant 0.000000e+00 : f32
      %44 = vector.broadcast %cst_35 : f32 to vector<128x128xf32>
      %c0_36 = arith.constant 0 : index
      %c0_37 = arith.constant 0 : index
      %45 = vector.load %arg8[%c0_36, %c0_37] : memref<128x128xf32, #tpu.memory_space<vmem>>, vector<128x128xf32>
      tpu.vector_store %arg8[%c0_36, %c0_37], %44 {strides = array<i32>} : memref<128x128xf32, #tpu.memory_space<vmem>>, vector<128x128xf32>,
    } else {
    }
    %c0 = arith.constant 0 : index
    %c0_1 = arith.constant 0 : index
    %c0_2 = arith.constant 0 : index
    %3 = vector.load %arg3[%c0, %c0_1, %c0_2] : memref<1x128x64xf32, #tpu.memory_space<vmem>>, vector<1x128x64xf32>
    %4 = vector.shape_cast %3 : vector<1x128x64xf32> to vector<128x64xf32>
    %c0_3 = arith.constant 0 : index
    %c0_4 = arith.constant 0 : index
    %c0_5 = arith.constant 0 : index
    %5 = vector.load %arg4[%c0_3, %c0_4, %c0_5] : memref<1x128x64xf32, #tpu.memory_space<vmem>>, vector<1x128x64xf32>
    %6 = vector.shape_cast %5 : vector<1x128x64xf32> to vector<128x64xf32>
    %c0_6 = arith.constant 0 : index
    %c0_7 = arith.constant 0 : index
    %c0_8 = arith.constant 0 : index
    %7 = vector.load %arg5[%c0_6, %c0_7, %c0_8] : memref<1x128x128xf32, #tpu.memory_space<vmem>>, vector<1x128x128xf32>
    %8 = vector.shape_cast %7 : vector<1x128x128xf32> to vector<128x128xf32>
    %cst = arith.constant 1.250000e-01 : f32
    %9 = vector.broadcast %cst : f32 to vector<128x64xf32>
    %10 = arith.mulf %4, %9 : vector<128x64xf32>
    %cst_9 = arith.constant dense<0.000000e+00> : vector<128x128xf32>
    %11 = tpu.matmul %10, %6, %cst_9 {dimension_numbers = #tpu.dot_dimension_numbers<[1], [1], [0], [0], [0, 0, 1, 0], [], []>} : vector<128x64xf32>, vector<128x64xf32>, vector<128x128xf32> -> vector<128x128xf32>
    %c0_10 = arith.constant 0 : index
    %c0_11 = arith.constant 0 : index
    %c0_12 = arith.constant 0 : index
    %12 = vector.load %arg6[%c0_10, %c0_11, %c0_12] : memref<1x128x128xf32, #tpu.memory_space<vmem>>, vector<1x128x128xf32>
    %13 = vector.shape_cast %12 : vector<1x128x128xf32> to vector<128x128xf32>
    %14 = arith.addf %11, %13 : vector<128x128xf32>
    %c0_13 = arith.constant 0 : index
    %c0_14 = arith.constant 0 : index
    %15 = vector.load %arg9[%c0_13, %c0_14] : memref<128x1xf32, #tpu.memory_space<vmem>>, vector<128x1xf32>
    %cst_15 = arith.constant dense<0xFF800000> : vector<128xf32>
    %16 = vector.multi_reduction <maximumf>, %14, %cst_15 [1] : vector<128x128xf32> to vector<128xf32>
    %17 = vector.shape_cast %16 : vector<128xf32> to vector<128x1xf32>
    %18 = arith.maximumf %15, %17 : vector<128x1xf32>
    %19 = arith.subf %15, %18 : vector<128x1xf32>
    %20 = math.exp %19 : vector<128x1xf32>
    %21 = vector.broadcast %18 : vector<128x1xf32> to vector<128x128xf32>
    %22 = arith.subf %14, %21 : vector<128x128xf32>
    %23 = math.exp %22 : vector<128x128xf32>
    %c0_16 = arith.constant 0 : index
    %c0_17 = arith.constant 0 : index
    %24 = vector.load %arg10[%c0_16, %c0_17] : memref<128x1xf32, #tpu.memory_space<vmem>>, vector<128x1xf32>
    %25 = arith.mulf %20, %24 : vector<128x1xf32>
    %cst_18 = arith.constant dense<0.000000e+00> : vector<128xf32>
    %26 = vector.multi_reduction <add>, %23, %cst_18 [1] : vector<128x128xf32> to vector<128xf32>
    %27 = vector.shape_cast %26 : vector<128xf32> to vector<128x1xf32>
    %28 = arith.addf %25, %27 : vector<128x1xf32>
    %c0_19 = arith.constant 0 : index
    %c0_20 = arith.constant 0 : index
    %29 = vector.load %arg10[%c0_19, %c0_20] : memref<128x1xf32, #tpu.memory_space<vmem>>, vector<128x1xf32>
    tpu.vector_store %arg10[%c0_19, %c0_20], %28 {strides = array<i32>} : memref<128x1xf32, #tpu.memory_space<vmem>>, vector<128x1xf32>,
    %c0_21 = arith.constant 0 : index
    %c0_22 = arith.constant 0 : index
    %30 = vector.load %arg9[%c0_21, %c0_22] : memref<128x1xf32, #tpu.memory_space<vmem>>, vector<128x1xf32>
    tpu.vector_store %arg9[%c0_21, %c0_22], %18 {strides = array<i32>} : memref<128x1xf32, #tpu.memory_space<vmem>>, vector<128x1xf32>,
    %cst_23 = arith.constant dense<0.000000e+00> : vector<128x128xf32>
    %31 = tpu.matmul %23, %8, %cst_23 {dimension_numbers = #tpu.dot_dimension_numbers<[1], [0], [0], [1], [0, 0, 1, 1], [], []>} : vector<128x128xf32>, vector<128x128xf32>, vector<128x128xf32> -> vector<128x128xf32>
    %c0_24 = arith.constant 0 : index
    %c0_25 = arith.constant 0 : index
    %32 = vector.load %arg8[%c0_24, %c0_25] : memref<128x128xf32, #tpu.memory_space<vmem>>, vector<128x128xf32>
    %33 = vector.broadcast %20 : vector<128x1xf32> to vector<128x128xf32>
    %34 = arith.mulf %33, %32 : vector<128x128xf32>
    %35 = arith.addf %34, %31 : vector<128x128xf32>
    %c0_26 = arith.constant 0 : index
    %c0_27 = arith.constant 0 : index
    %36 = vector.load %arg8[%c0_26, %c0_27] : memref<128x128xf32, #tpu.memory_space<vmem>>, vector<128x128xf32>
    tpu.vector_store %arg8[%c0_26, %c0_27], %35 {strides = array<i32>} : memref<128x128xf32, #tpu.memory_space<vmem>>, vector<128x128xf32>,
    %c1_i32 = arith.constant 1 : i32
    %37 = arith.cmpi eq, %arg2, %c1_i32 : i32
    %38 = arith.extui %37 : i1 to i32
    %c0_i32_28 = arith.constant 0 : i32
    %39 = arith.cmpi ne, %38, %c0_i32_28 : i32
    scf.if %39 {
      %c0_29 = arith.constant 0 : index
      %c0_30 = arith.constant 0 : index
      %40 = vector.load %arg10[%c0_29, %c0_30] : memref<128x1xf32, #tpu.memory_space<vmem>>, vector<128x1xf32>
      %41 = tpu.reciprocal %40 {approx = true} : vector<128x1xf32> -> vector<128x1xf32>
      %42 = arith.mulf %40, %41 : vector<128x1xf32>
      %cst_31 = arith.constant 2.000000e+00 : f32
      %43 = vector.broadcast %cst_31 : f32 to vector<128x1xf32>
      %44 = arith.subf %43, %42 : vector<128x1xf32>
      %45 = arith.mulf %41, %44 : vector<128x1xf32>
      %c0_32 = arith.constant 0 : index
      %c0_33 = arith.constant 0 : index
      %46 = vector.load %arg8[%c0_32, %c0_33] : memref<128x128xf32, #tpu.memory_space<vmem>>, vector<128x128xf32>
      %47 = vector.broadcast %45 : vector<128x1xf32> to vector<128x128xf32>
      %48 = arith.mulf %46, %47 : vector<128x128xf32>
      %c0_34 = arith.constant 0 : index
      %c0_35 = arith.constant 0 : index
      %c0_36 = arith.constant 0 : index
      %49 = vector.load %arg7[%c0_34, %c0_35, %c0_36] : memref<1x128x128xf32, #tpu.memory_space<vmem>>, vector<1x128x128xf32>
      %50 = vector.shape_cast %49 : vector<1x128x128xf32> to vector<128x128xf32>
      %51 = vector.shape_cast %48 : vector<128x128xf32> to vector<1x128x128xf32>
      tpu.vector_store %arg7[%c0_34, %c0_35, %c0_36], %51 {strides = array<i32>} : memref<1x128x128xf32, #tpu.memory_space<vmem>>, vector<1x128x128xf32>,
    } else {
    }
    return
  }
  func.func @transform_0(%arg0: i32, %arg1: i32, %arg2: i32) -> (i32, i32, i32) {
    %c0_i32 = arith.constant 0 : i32
    %c0_i32_0 = arith.constant 0 : i32
    return %arg0, %arg1, %c0_i32 : i32, i32, i32
  }
  func.func @transform_1(%arg0: i32, %arg1: i32, %arg2: i32) -> (i32, i32, i32) {
    %c0_i32 = arith.constant 0 : i32
    %c0_i32_0 = arith.constant 0 : i32
    return %arg0, %arg2, %c0_i32 : i32, i32, i32
  }
  func.func @transform_2(%arg0: i32, %arg1: i32, %arg2: i32) -> (i32, i32, i32) {
    %c0_i32 = arith.constant 0 : i32
    %c0_i32_0 = arith.constant 0 : i32
    return %arg0, %arg2, %c0_i32 : i32, i32, i32
  }
  func.func @transform_3(%arg0: i32, %arg1: i32, %arg2: i32) -> (i32, i32, i32) {
    %c0_i32 = arith.constant 0 : i32
    return %arg0, %arg1, %arg2 : i32, i32, i32
  }
  func.func @transform_4(%arg0: i32, %arg1: i32, %arg2: i32) -> (i32, i32, i32) {
    %c0_i32 = arith.constant 0 : i32
    %c0_i32_0 = arith.constant 0 : i32
    return %arg0, %arg1, %c0_i32 : i32, i32, i32
  }
}

</mosaic_0001>

<bundles_post_ra>
// kernel: tpu_custom_call.1
= control target key start
LH: loop header
LB: loop body
LE: loop exit
PB: predicated region body
PF: predicated region fallthrough
CT: control target
= control target key end

     0   :  { %s3083_s0 = inlined_call_operand.vmem [shape: f32[2,128,64], index: 0, kind: input, shape index: {}]   ;;  %s3084_s1 = inlined_call_operand.vmem [shape: f32[2,256,64], index: 1, kind: input, shape index: {}]   ;;  %s3085_s2 = inlined_call_operand.vmem [shape: f32[2,256,128], index: 2, kind: input, shape index: {}]   ;;  %s3086_s3 = inlined_call_operand.vmem [shape: f32[2,128,256], index: 3, kind: input, shape index: {}]   ;;  %s3087_s4 = inlined_call_operand.hbm [shape: f32[2,128,128], index: 4, kind: output, shape index: {}]  }
   0x1   :  { %3094 = sst [smem:[#allocation15_spill]] %s3086_s3 }
   0x2   :  { %9 = vsyncpa [#allocation7], 0 }
   0x3   :  { %11 = vsyncpa [#allocation7 + $0x1], 0  ;;  %s2389_s15 = smov 0   ;;  %s2391_s16 = smov 0  }
   0x4   :  { %s2393_s17 = smov 0   ;;  %s2395_s18 = smov 0  }
   0x5   :  { %s2397_s19 = smov 0   ;;  %s2399_s20 = smov 0  }
   0x6   :  { %s2401_s21 = smov 0   ;;  %s2403_s22 = smov 0  }
   0x7   :  { %s2405_s23 = smov 0   ;;  %s2407_s24 = smov 0  }
   0x8 LB: > { %3095 = sst [smem:[#allocation9_spill]] %s2335_s19  ;;  %s1819_s25 = sadd.s32 4294967295, %s2355_s24   ;;  %s2355_s24 = sphi %s2407_s24, %s17_s24   ;;  %s2351_s23 = sphi %s2405_s23, %s3111_s23   ;;  %s2347_s22 = sphi %s2403_s22, %s3110_s22   ;;  %s2343_s21 = sphi %s2401_s21, %s3109_s21   ;;  %s2339_s20 = sphi %s2399_s20, %s3108_s20   ;;  %s2335_s19 = sphi %s2397_s19, %s3107_s19   ;;  %s2331_s18 = sphi %s2395_s18, %s3106_s18   ;;  %s2327_s17 = sphi %s2393_s17, %s3114_s17   ;;  %s2323_s16 = sphi %s2391_s16, %s3113_s16   ;;  %s2319_s15 = sphi %s2389_s15, %s3112_s15  }
   0x9   : > { %3096 = sst [smem:[#allocation10_spill]] %s2347_s22  ;;  %s1820_s26 = sadd.s32 4294967294, %s2355_s24  }
   0xa   : > { %3097 = sst [smem:[#allocation11_spill]] %s2351_s23  ;;  %s29_s27 = sadd.s32 1, %s2347_s22 }
   0xb   : > { %s36_s28 = sadd.s32 1, %s2351_s23  ;;  %p30_p0 = scmp.ge.s32.totalorder %s29_s27, 2 }
   0xc   : > { %s131_s29 = sadd.s32 1, %s2335_s19  ;;  %p138_p1 = scmp.ne.s32.totalorder %s2335_s19, %s2331_s18 }
   0xd   : > { %p139_p2 = scmp.eq.s32.totalorder %s2355_s24, 0  ;;  %s3116_s27 = smov (%p30_p0, %s29_s27), 0 }
   0xe   : > { %3098 = sst [smem:[#allocation12_spill]] %s3116_s27  ;;  %s3118_s28 = smov (!%p30_p0, %s36_s28), %s2351_s23 }
   0xf   : > { %s127_s30 = ssub.s32 %s2347_s22, %s3116_s27  ;;  %p2452_p3 = por %p139_p2, %p138_p1 }
  0x10   : > { %p38_p4 = scmp.ge.s32.totalorder %s3118_s28, 2  ;;  %s159_s6 = sadd.s32 1, %s2327_s17 }
  0x11   : > { %p169_p5 = scmp.ne.s32.totalorder %s2327_s17, %s2323_s16  ;;  %p170_p6 = scmp.eq.s32.totalorder %s1819_s25, 3 }
  0x12   : > { %s3120_s28 = smov (%p38_p4, %s3118_s28), 0  ;;  %p175_p8 = scmp.ne.s32.totalorder %s2323_s16, %s2319_s15 }
  0x13   : > { %3100 = sst [smem:[#allocation13_spill]] %s3120_s28  ;;  %p2461_p7 = por %p170_p6, %p169_p5 }
  0x14   : > { %s124_s8 = ssub.s32 %s2351_s23, %s3120_s28  ;;  %p176_p9 = scmp.eq.s32.totalorder %s1820_s26, 3 }
  0x15   : > { %s128_s9 = sor.u32 %s127_s30, %s124_s8  ;;  %p157_p10 = scmp.eq.s32.totalorder %s124_s8, 0 }
  0x16   : > { %p129_p11 = scmp.eq.s32.totalorder %s128_s9, 0  ;;  %p2469_p12 = por %p176_p9, %p175_p8 }
  0x17   : > { %s2474_s11 = scalar_select %p157_p10, %s2327_s17, %s159_s6  }
  0x18   : > { %s2477_s12 = scalar_select %p129_p11, %s2335_s19, %s131_s29  }
  0x19   : > { %p1822_p13 = scmp.ge.s32.totalorder %s2355_s24, 4 }
  0x1a   : > { %3103 = sst [smem:[#allocation14_spill]] %s2477_s12 }
  0x1b   : > { %192 = sbr.rel (%p1822_p13) target bundleno = 50 (0x32), region = 16 }
  0x20   : > { %234 = sbr.rel (!%p2452_p3) target bundleno = 50 (0x32), region = 32  ;;  %s236_s13 = sand.u32 (%p2452_p3), 1, %s2335_s19  }
  0x21   : > { %s1824_s14 = sshll.u32 (%p2452_p3), %s2351_s23, 5  ;;  %s1823_s25 = sshll.u32 (%p2452_p3), %s236_s13, 7 }
  0x22   : > { %s243_s26 = sadd.s32 (%p2452_p3), %s2347_s22, %s1824_s14  ;;  %s3104_s3 = sld [smem:[#allocation15_spill]] (%p2452_p3) }
  0x23   : > { %s1825_s30 = sshll.u32 (%p2452_p3), %s243_s26, 3  ;;  %s238_s29 = scalar_lea.vmem (%p2452_p3), [#allocation5], %s1823_s25 }
  0x28   : > { %s2488_s6 = scalar_lea.vmem %s3104_s3, %s1825_s30 }
  0x29   : > { %v304_v0 = vld [vmem:[%s2488_s6] sm:$0xff]  ;;  %v306_v1 = vld [vmem:[%s2488_s6 + $0x10] sm:$0xff] }
  0x2a   : > { %v308_v2 = vld [vmem:[%s2488_s6 + $0x20] sm:$0xff]  ;;  %305 = vst [vmem:[%s238_s29] sm:$0xff] %v304_v0  ;;  %307 = vst [vmem:[%s238_s29 + $0x8] sm:$0xff] %v306_v1  ;;  %v310_v3 = vld [vmem:[%s2488_s6 + $0x30] sm:$0xff] }
  0x2b   : > { %309 = vst [vmem:[%s238_s29 + $0x10] sm:$0xff] %v308_v2  ;;  %v312_v4 = vld [vmem:[%s2488_s6 + $0x40] sm:$0xff]  ;;  %v314_v5 = vld [vmem:[%s2488_s6 + $0x50] sm:$0xff]  ;;  %311 = vst [vmem:[%s238_s29 + $0x18] sm:$0xff] %v310_v3 }
  0x2c   : > { %313 = vst [vmem:[%s238_s29 + $0x20] sm:$0xff] %v312_v4  ;;  %315 = vst [vmem:[%s238_s29 + $0x28] sm:$0xff] %v314_v5  ;;  %v316_v6 = vld [vmem:[%s2488_s6 + $0x60] sm:$0xff]  ;;  %v318_v7 = vld [vmem:[%s2488_s6 + $0x70] sm:$0xff] }
  0x2d   : > { %v320_v8 = vld [vmem:[%s2488_s6 + $0x80] sm:$0xff]  ;;  %317 = vst [vmem:[%s238_s29 + $0x30] sm:$0xff] %v316_v6  ;;  %319 = vst [vmem:[%s238_s29 + $0x38] sm:$0xff] %v318_v7  ;;  %v322_v9 = vld [vmem:[%s2488_s6 + $0x90] sm:$0xff] }
  0x2e   : > { %321 = vst [vmem:[%s238_s29 + $0x40] sm:$0xff] %v320_v8  ;;  %v324_v10 = vld [vmem:[%s2488_s6 + $0xa0] sm:$0xff]  ;;  %v326_v11 = vld [vmem:[%s2488_s6 + $0xb0] sm:$0xff]  ;;  %323 = vst [vmem:[%s238_s29 + $0x48] sm:$0xff] %v322_v9 }
  0x2f   : > { %325 = vst [vmem:[%s238_s29 + $0x50] sm:$0xff] %v324_v10  ;;  %327 = vst [vmem:[%s238_s29 + $0x58] sm:$0xff] %v326_v11  ;;  %v328_v12 = vld [vmem:[%s2488_s6 + $0xc0] sm:$0xff]  ;;  %v330_v13 = vld [vmem:[%s2488_s6 + $0xd0] sm:$0xff] }
  0x30   : > { %v332_v14 = vld [vmem:[%s2488_s6 + $0xe0] sm:$0xff]  ;;  %329 = vst [vmem:[%s238_s29 + $0x60] sm:$0xff] %v328_v12  ;;  %331 = vst [vmem:[%s238_s29 + $0x68] sm:$0xff] %v330_v13  ;;  %v334_v15 = vld [vmem:[%s2488_s6 + $0xf0] sm:$0xff] }
  0x31   : > { %333 = vst [vmem:[%s238_s29 + $0x70] sm:$0xff] %v332_v14  ;;  %335 = vst [vmem:[%s238_s29 + $0x78] sm:$0xff] %v334_v15 }
  0x32 PF: > { %p1826_p0 = scmp.ge.s32.totalorder %s2355_s24, 1  ;;  %p340_p1 = scmp.lt.s32.totalorder %s2355_s24, 5 }
  0x34   : > { %p341_p2 = pnand %p1826_p0, %p340_p1 }
  0x35   : > { %s347_s5 = sand.u32 (!%p341_p2), 1, %s2331_s18   ;;  %s3091_s13 = sand.u32 (!%p341_p2), 1, %s2323_s16  }
  0x36   : > { %344 = sbr.rel (%p341_p2) target bundleno = 1079 (0x437), region = 70  ;;  %s1827_s14 = sshll.u32 (!%p341_p2), %s347_s5, 7 }
  0x37   : > { %s1828_s25 = sshll.u32 (!%p341_p2), %s3091_s13, 7  ;;  %p400_p3 = scmp.lt.s32.totalorder (!%p341_p2), %s2343_s21, 1 }
  0x38   : > { %s1831_s26 = sshll.u32 (!%p341_p2), %s2339_s20, 4  ;;  %s2530_s19 = scalar_lea.vmem (!%p341_p2), [#allocation5], %s1827_s14 }
  0x39   : > { %p412_p4 = scmp.lt.s32.totalorder (!%p341_p2), %s1831_s26, 31  ;;  %p1837_p5 = scmp.ne.s32.totalorder (!%p341_p2), %s2339_s20, 0 }
  0x3b   : > { %s401_s30 = scalar_select %p400_p3, %s2343_s21, 1 }
  0x3c   : > { %s3122_s26 = smov (!%p412_p4, %s1831_s26), 31  ;;  %434 = sbr.rel (%p1837_p5) target bundleno = 90 (0x5a), region = 78 }
  0x3d   : > { %s1876_s8 = sshll.u32 %s401_s30, 7  ;;  %s1832_s9 = sshll.u32 %s401_s30, 5 }
  0x3e   : > { %s2518_s3 = scalar_lea.vmem %s3083_s0, %s1876_s8  ;;  %s415_s28 = sadd.s32 %s1832_s9, %s3122_s26 }
  0x3f   : > { %s1833_s27 = sshll.u32 %s415_s28, 3  ;;  %s2532_s30 = scalar_lea.vmem [#allocation6], %s1828_s25 }
  0x40   : > { %s2523_s5 = scalar_lea.vmem %s3084_s1, %s1833_s27  ;;  %s2528_s12 = scalar_lea.vmem %s3085_s2, %s1833_s27 }
  0x41   : > { %vm435_vm0 = vcmask 7168   ;;  %v2357_v16 = vmov -inf   ;;  %v2358_v17 = vmov 0.0  }
  0x42   : > { %436 = vst.msk [vmem:[#allocation3] sm:$0xff] %vm435_vm0, %v2357_v16  ;;  %437 = vst.msk [vmem:[#allocation3 + $0x8] sm:$0xff] %vm435_vm0, %v2357_v16 }
  0x43   : > { %438 = vst.msk [vmem:[#allocation3 + $0x10] sm:$0xff] %vm435_vm0, %v2357_v16  ;;  %439 = vst.msk [vmem:[#allocation3 + $0x18] sm:$0xff] %vm435_vm0, %v2357_v16 }
  0x44   : > { %440 = vst.msk [vmem:[#allocation3 + $0x20] sm:$0xff] %vm435_vm0, %v2357_v16  ;;  %441 = vst.msk [vmem:[#allocation3 + $0x28] sm:$0xff] %vm435_vm0, %v2357_v16 }
  0x45   : > { %442 = vst.msk [vmem:[#allocation3 + $0x30] sm:$0xff] %vm435_vm0, %v2357_v16  ;;  %443 = vst.msk [vmem:[#allocation3 + $0x38] sm:$0xff] %vm435_vm0, %v2357_v16 }
  0x46   : > { %444 = vst.msk [vmem:[#allocation3 + $0x40] sm:$0xff] %vm435_vm0, %v2357_v16  ;;  %445 = vst.msk [vmem:[#allocation3 + $0x48] sm:$0xff] %vm435_vm0, %v2357_v16 }
  0x47   : > { %446 = vst.msk [vmem:[#allocation3 + $0x50] sm:$0xff] %vm435_vm0, %v2357_v16  ;;  %447 = vst.msk [vmem:[#allocation3 + $0x58] sm:$0xff] %vm435_vm0, %v2357_v16 }
  0x48   : > { %448 = vst.msk [vmem:[#allocation3 + $0x60] sm:$0xff] %vm435_vm0, %v2357_v16  ;;  %449 = vst.msk [vmem:[#allocation3 + $0x68] sm:$0xff] %vm435_vm0, %v2357_v16 }
  0x49   : > { %450 = vst.msk [vmem:[#allocation3 + $0x70] sm:$0xff] %vm435_vm0, %v2357_v16  ;;  %451 = vst.msk [vmem:[#allocation3 + $0x78] sm:$0xff] %vm435_vm0, %v2357_v16 }
  0x4a   : > { %452 = vst.msk [vmem:[#allocation4] sm:$0xff] %vm435_vm0, %v2358_v17  ;;  %453 = vst.msk [vmem:[#allocation4 + $0x8] sm:$0xff] %vm435_vm0, %v2358_v17 }
  0x4b   : > { %454 = vst.msk [vmem:[#allocation4 + $0x10] sm:$0xff] %vm435_vm0, %v2358_v17  ;;  %455 = vst.msk [vmem:[#allocation4 + $0x18] sm:$0xff] %vm435_vm0, %v2358_v17 }
  0x4c   : > { %456 = vst.msk [vmem:[#allocation4 + $0x20] sm:$0xff] %vm435_vm0, %v2358_v17  ;;  %457 = vst.msk [vmem:[#allocation4 + $0x28] sm:$0xff] %vm435_vm0, %v2358_v17 }
  0x4d   : > { %458 = vst.msk [vmem:[#allocation4 + $0x30] sm:$0xff] %vm435_vm0, %v2358_v17  ;;  %459 = vst.msk [vmem:[#allocation4 + $0x38] sm:$0xff] %vm435_vm0, %v2358_v17 }
  0x4e   : > { %460 = vst.msk [vmem:[#allocation4 + $0x40] sm:$0xff] %vm435_vm0, %v2358_v17  ;;  %461 = vst.msk [vmem:[#allocation4 + $0x48] sm:$0xff] %vm435_vm0, %v2358_v17 }
  0x4f   : > { %462 = vst.msk [vmem:[#allocation4 + $0x50] sm:$0xff] %vm435_vm0, %v2358_v17  ;;  %463 = vst.msk [vmem:[#allocation4 + $0x58] sm:$0xff] %vm435_vm0, %v2358_v17 }
  0x50   : > { %464 = vst.msk [vmem:[#allocation4 + $0x60] sm:$0xff] %vm435_vm0, %v2358_v17  ;;  %465 = vst.msk [vmem:[#allocation4 + $0x68] sm:$0xff] %vm435_vm0, %v2358_v17 }
  0x51   : > { %466 = vst.msk [vmem:[#allocation4 + $0x70] sm:$0xff] %vm435_vm0, %v2358_v17  ;;  %467 = vst.msk [vmem:[#allocation4 + $0x78] sm:$0xff] %vm435_vm0, %v2358_v17 }
  0x52   : > { %468 = vst [vmem:[#allocation2 + $0x30] sm:$0xff] %v2358_v17  ;;  %469 = vst [vmem:[#allocation2] sm:$0xff] %v2358_v17 }
  0x53   : > { %470 = vst [vmem:[#allocation2 + $0x58] sm:$0xff] %v2358_v17  ;;  %471 = vst [vmem:[#allocation2 + $0x18] sm:$0xff] %v2358_v17 }
  0x54   : > { %472 = vst [vmem:[#allocation2 + $0x50] sm:$0xff] %v2358_v17  ;;  %473 = vst [vmem:[#allocation2 + $0x68] sm:$0xff] %v2358_v17 }
  0x55   : > { %474 = vst [vmem:[#allocation2 + $0x8] sm:$0xff] %v2358_v17  ;;  %475 = vst [vmem:[#allocation2 + $0x48] sm:$0xff] %v2358_v17 }
  0x56   : > { %476 = vst [vmem:[#allocation2 + $0x40] sm:$0xff] %v2358_v17  ;;  %477 = vst [vmem:[#allocation2 + $0x20] sm:$0xff] %v2358_v17 }
  0x57   : > { %478 = vst [vmem:[#allocation2 + $0x10] sm:$0xff] %v2358_v17  ;;  %479 = vst [vmem:[#allocation2 + $0x38] sm:$0xff] %v2358_v17 }
  0x58   : > { %480 = vst [vmem:[#allocation2 + $0x60] sm:$0xff] %v2358_v17  ;;  %481 = vst [vmem:[#allocation2 + $0x70] sm:$0xff] %v2358_v17 }
  0x59   : > { %482 = vst [vmem:[#allocation2 + $0x78] sm:$0xff] %v2358_v17  ;;  %483 = vst [vmem:[#allocation2 + $0x28] sm:$0xff] %v2358_v17 }
  0x5a PF: > { %v515_v18 = vld [vmem:[%s2523_s5 + $0x78] sm:$0xff]  ;;  %vm564_vm1 = vcmask 523264   ;;  %v514_v19 = vld [vmem:[%s2523_s5 + $0x70] sm:$0xff]  ;;  %v513_v20 = vld [vmem:[%s2523_s5 + $0x68] sm:$0xff]  ;;  %vm1126_vm2 = vcmask 7168   ;;  %p1870_p6 = scmp.ne.s32.totalorder %s2339_s20, 1 }
  0x5b   : > { %1942 = vmatprep.subr.msk.mxu0 %vm564_vm1, %v515_v18  ;;  %v484_v21 = vld [vmem:[%s2518_s3] sm:$0xff]  ;;  %v511_v24 = vld [vmem:[%s2523_s5 + $0x58] sm:$0xff]  ;;  %v510_v25 = vld [vmem:[%s2523_s5 + $0x50] sm:$0xff] }
  0x5c   : > { %1943 = vmatpush3.xpose.msk.msra.mxu0 %vm564_vm1, %v515_v18  ;;  %v532_v22 = vmul.f32 0.125, %v484_v21  ;;  %v512_v23 = vld [vmem:[%s2523_s5 + $0x60] sm:$0xff]  ;;  %v509_v26 = vld [vmem:[%s2523_s5 + $0x48] sm:$0xff]  ;;  %v507_v28 = vld [vmem:[%s2523_s5 + $0x38] sm:$0xff] }
  0x5d   : > { %1944 = vmatprep.subr.msk.mxu0 %vm564_vm1, %v514_v19  ;;  %v508_v27 = vld [vmem:[%s2523_s5 + $0x40] sm:$0xff]  ;;  %v506_v29 = vld [vmem:[%s2523_s5 + $0x30] sm:$0xff]  ;;  %v505_v30 = vld [vmem:[%s2523_s5 + $0x28] sm:$0xff] }
  0x5e   : > { %1974 = vmatprep.mubr.msk.f32.mxu0 %vm564_vm1, %v532_v22  ;;  %v504_v31 = vld [vmem:[%s2523_s5 + $0x20] sm:$0xff]  ;;  %v503_v32 = vld [vmem:[%s2523_s5 + $0x18] sm:$0xff]  ;;  %v502_v33 = vld [vmem:[%s2523_s5 + $0x10] sm:$0xff] }
  0x5f   : > { %v501_v34 = vld [vmem:[%s2523_s5 + $0x8] sm:$0xff]  ;;  %v500_v35 = vld [vmem:[%s2523_s5] sm:$0xff]  ;;  %v486_v37 = vld [vmem:[%s2518_s3 + $0x10] sm:$0xff] }
  0x60   : > { %1945 = vmatpush3.xpose.msk.msra.mxu0 %vm564_vm1, %v514_v19  ;;  %v485_v36 = vld [vmem:[%s2518_s3 + $0x8] sm:$0xff]  ;;  %v534_v39 = vmul.f32 0.125, %v486_v37  ;;  %v487_v40 = vld [vmem:[%s2518_s3 + $0x18] sm:$0xff]  ;;  %v488_v41 = vld [vmem:[%s2518_s3 + $0x20] sm:$0xff] }
  0x61   : > { %1946 = vmatprep.subr.msk.mxu0 %vm564_vm1, %v513_v20  ;;  %v533_v38 = vmul.f32 0.125, %v485_v36  ;;  %v535_v42 = vmul.f32 0.125, %v487_v40  ;;  %v536_v43 = vmul.f32 0.125, %v488_v41  ;;  %v489_v44 = vld [vmem:[%s2518_s3 + $0x28] sm:$0xff]  ;;  %v490_v45 = vld [vmem:[%s2518_s3 + $0x30] sm:$0xff]  ;;  %v491_v48 = vld [vmem:[%s2518_s3 + $0x38] sm:$0xff] }
  0x62   : > { %v537_v46 = vmul.f32 0.125, %v489_v44  ;;  %v538_v47 = vmul.f32 0.125, %v490_v45  ;;  %v492_v49 = vld [vmem:[%s2518_s3 + $0x40] sm:$0xff]  ;;  %v539_v50 = vmul.f32 0.125, %v491_v48  ;;  %v493_v52 = vld [vmem:[%s2518_s3 + $0x48] sm:$0xff]  ;;  %v494_v53 = vld [vmem:[%s2518_s3 + $0x50] sm:$0xff] }
  0x63   : > { %v540_v51 = vmul.f32 0.125, %v492_v49  ;;  %v541_v54 = vmul.f32 0.125, %v493_v52  ;;  %v542_v55 = vmul.f32 0.125, %v494_v53  ;;  %v495_v56 = vld [vmem:[%s2518_s3 + $0x58] sm:$0xff]  ;;  %v496_v57 = vld [vmem:[%s2518_s3 + $0x60] sm:$0xff]  ;;  %v497_v60 = vld [vmem:[%s2518_s3 + $0x68] sm:$0xff] }
  0x64   : > { %1947 = vmatpush3.xpose.msk.msra.mxu0 %vm564_vm1, %v513_v20  ;;  %v543_v58 = vmul.f32 0.125, %v495_v56  ;;  %v544_v59 = vmul.f32 0.125, %v496_v57  ;;  %v498_v61 = vld [vmem:[%s2518_s3 + $0x70] sm:$0xff]  ;;  %v545_v62 = vmul.f32 0.125, %v497_v60  ;;  %v499_v0 = vld [vmem:[%s2518_s3 + $0x78] sm:$0xff]  ;;  %v548_v3 = vld [vmem:[%s2530_s19] sm:$0xff] }
  0x65   : > { %1948 = vmatprep.subr.msk.mxu0 %vm564_vm1, %v512_v23  ;;  %v546_v63 = vmul.f32 0.125, %v498_v61  ;;  %v547_v1 = vmul.f32 0.125, %v499_v0  ;;  %v551_v5 = vld [vmem:[%s2530_s19 + $0x18] sm:$0xff]  ;;  %v549_v7 = vld [vmem:[%s2530_s19 + $0x8] sm:$0xff]  ;;  %v550_v9 = vld [vmem:[%s2530_s19 + $0x10] sm:$0xff] }
  0x66   : > { %v553_v14 = vld [vmem:[%s2530_s19 + $0x28] sm:$0xff]  ;;  %v552_v16 = vld [vmem:[%s2530_s19 + $0x20] sm:$0xff]  ;;  %v555_v20 = vld [vmem:[%s2530_s19 + $0x38] sm:$0xff] }
  0x67   : > { %v554_v22 = vld [vmem:[%s2530_s19 + $0x30] sm:$0xff]  ;;  %v560_v41 = vld [vmem:[%s2530_s19 + $0x60] sm:$0xff]  ;;  %v563_v45 = vld [vmem:[%s2530_s19 + $0x78] sm:$0xff] }
  0x68   : > { %1949 = vmatpush3.xpose.msk.msra.mxu0 %vm564_vm1, %v512_v23  ;;  %v530_v52 = vld [vmem:[%s2528_s12 + $0x70] sm:$0xff]  ;;  %v529_v53 = vld [vmem:[%s2528_s12 + $0x68] sm:$0xff]  ;;  %v2716_v56 = vld [vmem:[#allocation3] sm:$0xff] }
  0x69   : > { %1950 = vmatprep.subr.msk.mxu0 %vm564_vm1, %v511_v24  ;;  %v526_v57 = vld [vmem:[%s2528_s12 + $0x50] sm:$0xff]  ;;  %v525_v60 = vld [vmem:[%s2528_s12 + $0x48] sm:$0xff]  ;;  %v524_v0 = vld [vmem:[%s2528_s12 + $0x40] sm:$0xff] }
  0x6c   : > { %1951 = vmatpush3.xpose.msk.msra.mxu0 %vm564_vm1, %v511_v24 }
  0x6d   : > { %1952 = vmatprep.subr.msk.mxu0 %vm564_vm1, %v510_v25 }
  0x70   : > { %1953 = vmatpush3.xpose.msk.msra.mxu0 %vm564_vm1, %v510_v25 }
  0x71   : > { %1954 = vmatprep.subr.msk.mxu0 %vm564_vm1, %v509_v26 }
  0x74   : > { %1955 = vmatpush3.xpose.msk.msra.mxu0 %vm564_vm1, %v509_v26  ;;  %v557_v26 = vld [vmem:[%s2530_s19 + $0x48] sm:$0xff] }
  0x75   : > { %1956 = vmatprep.subr.msk.mxu0 %vm564_vm1, %v508_v27 }
  0x78   : > { %1957 = vmatpush3.xpose.msk.msra.mxu0 %vm564_vm1, %v508_v27 }
  0x79   : > { %1958 = vmatprep.subr.msk.mxu0 %vm564_vm1, %v507_v28 }
  0x7c   : > { %1959 = vmatpush3.xpose.msk.msra.mxu0 %vm564_vm1, %v507_v28  ;;  %v556_v28 = vld [vmem:[%s2530_s19 + $0x40] sm:$0xff] }
  0x7d   : > { %1960 = vmatprep.subr.msk.mxu0 %vm564_vm1, %v506_v29 }
  0x80   : > { %1961 = vmatpush3.xpose.msk.msra.mxu0 %vm564_vm1, %v506_v29  ;;  %v2359_v29 = vmov 0  }
  0x81   : > { %1962 = vmatprep.subr.msk.mxu0 %vm564_vm1, %v505_v30  ;;  %2147 = vset.pattern.permute.xlu0 %v2359_v29 }
  0x82   : > { %2148 = vset.pattern.permute.xlu1 %v2359_v29 }
  0x84   : > { %1963 = vmatpush3.xpose.msk.msra.mxu0 %vm564_vm1, %v505_v30 }
  0x85   : > { %1964 = vmatprep.subr.msk.mxu0 %vm564_vm1, %v504_v31 }
  0x88   : > { %1965 = vmatpush3.xpose.msk.msra.mxu0 %vm564_vm1, %v504_v31 }
  0x89   : > { %1966 = vmatprep.subr.msk.mxu0 %vm564_vm1, %v503_v32 }
  0x8c   : > { %1967 = vmatpush3.xpose.msk.msra.mxu0 %vm564_vm1, %v503_v32 }
  0x8d   : > { %1968 = vmatprep.subr.msk.mxu0 %vm564_vm1, %v502_v33 }
  0x90   : > { %1969 = vmatpush3.xpose.msk.msra.mxu0 %vm564_vm1, %v502_v33  ;;  %v559_v33 = vld [vmem:[%s2530_s19 + $0x58] sm:$0xff] }
  0x91   : > { %1970 = vmatprep.subr.msk.mxu0 %vm564_vm1, %v501_v34 }
  0x94   : > { %1971 = vmatpush3.xpose.msk.msra.mxu0 %vm564_vm1, %v501_v34 }
  0x95   : > { %1972 = vmatprep.subr.msk.mxu0 %vm564_vm1, %v500_v35 }
  0x98   : > { %1973 = vmatpush3.xpose.msk.msra.mxu0 %vm564_vm1, %v500_v35  ;;  %v558_v35 = vld [vmem:[%s2530_s19 + $0x50] sm:$0xff] }
  0x9b   : > { %1975 = vmatmul.mubr.msk.f32.vlgmr.msra.gmra.mxu0 %vm564_vm1, %v533_v38 }
  0x9c   : > { %1977 = vmatprep.mubr.msk.f32.mxu0 %vm564_vm1, %v534_v39  ;;  %v561_v39 = vld [vmem:[%s2530_s19 + $0x68] sm:$0xff] }
  0x9f   : > { %1978 = vmatmul.mubr.msk.f32.gmra.mxu0 %vm564_vm1, %v535_v42 }
  0xa0   : > { %1980 = vmatprep.mubr.msk.f32.mxu0 %vm564_vm1, %v536_v43 }
  0xa3   : > { %1981 = vmatmul.mubr.msk.f32.gmra.mxu0 %vm564_vm1, %v537_v46 }
  0xa4   : > { %1983 = vmatprep.mubr.msk.f32.mxu0 %vm564_vm1, %v538_v47  ;;  %v562_v47 = vld [vmem:[%s2530_s19 + $0x70] sm:$0xff] }
  0xa7   : > { %1984 = vmatmul.mubr.msk.f32.gmra.mxu0 %vm564_vm1, %v539_v50 }
  0xa8   : > { %1986 = vmatprep.mubr.msk.f32.mxu0 %vm564_vm1, %v540_v51  ;;  %v531_v51 = vld [vmem:[%s2528_s12 + $0x78] sm:$0xff] }
  0xa9   : > { %1998 = vmatprep.subr.mxu1 %v531_v51 }
  0xaa   : > { %1999 = vmatpush3.msra.mxu1 %v531_v51 }
  0xab   : > { %1987 = vmatmul.mubr.msk.f32.gmra.mxu0 %vm564_vm1, %v541_v54  ;;  %2000 = vmatprep.subr.mxu1 %v530_v52  ;;  %v528_v54 = vld [vmem:[%s2528_s12 + $0x60] sm:$0xff] }
  0xac   : > { %1989 = vmatprep.mubr.msk.f32.mxu0 %vm564_vm1, %v542_v55  ;;  %2001 = vmatpush3.msra.mxu1 %v530_v52  ;;  %v527_v55 = vld [vmem:[%s2528_s12 + $0x58] sm:$0xff] }
  0xad   : > { %2002 = vmatprep.subr.mxu1 %v529_v53 }
  0xae   : > { %2003 = vmatpush3.msra.mxu1 %v529_v53  ;;  %v817_v53 = vld [vmem:[#allocation3 + $0x58] sm:$0xff] }
  0xaf   : > { %1990 = vmatmul.mubr.msk.f32.gmra.mxu0 %vm564_vm1, %v543_v58  ;;  %2004 = vmatprep.subr.mxu1 %v528_v54 }
  0xb0   : > { %1992 = vmatprep.mubr.msk.f32.mxu0 %vm564_vm1, %v544_v59  ;;  %2005 = vmatpush3.msra.mxu1 %v528_v54  ;;  %v2719_v59 = vld [vmem:[#allocation3 + $0x18] sm:$0xff] }
  0xb1   : > { %2006 = vmatprep.subr.mxu1 %v527_v55 }
  0xb2   : > { %2007 = vmatpush3.msra.mxu1 %v527_v55 }
  0xb3   : > { %1993 = vmatmul.mubr.msk.f32.gmra.mxu0 %vm564_vm1, %v545_v62  ;;  %2008 = vmatprep.subr.mxu1 %v526_v57 }
  0xb4   : > { %1995 = vmatprep.mubr.msk.f32.mxu0 %vm564_vm1, %v546_v63  ;;  %2009 = vmatpush3.msra.mxu1 %v526_v57  ;;  %v2725_v63 = vld [vmem:[#allocation3 + $0x8] sm:$0xff] }
  0xb5   : > { %2010 = vmatprep.subr.mxu1 %v525_v60 }
  0xb6   : > { %2011 = vmatpush3.msra.mxu1 %v525_v60 }
  0xb7   : > { %1996 = vmatmul.mubr.msk.f32.gmra.mxu0 %vm564_vm1, %v547_v1  ;;  %2012 = vmatprep.subr.mxu1 %v524_v0 }
  0xb8   : > { %2013 = vmatpush3.msra.mxu1 %v524_v0 }
 0x15b   : > { %v1976_v2 = vpop.f32.mrf.mxu0 }
 0x15c   : > { %v2656_v12 = vadd.f32 %v1976_v2, %v549_v7 }
 0x15d   : > { %v727_v4 = vpop.f32.mrf.mxu0 }
 0x15e   : > { %v2649_v6 = vadd.f32 %v727_v4, %v548_v3  ;;  %v2734_v3 = vld [vmem:[#allocation3 + $0x10] sm:$0xff]  ;;  %v523_v4 = vld [vmem:[%s2528_s12 + $0x38] sm:$0xff] }
 0x15f   : > { %v1979_v8 = vpop.f32.mrf.mxu0  ;;  %2014 = vmatprep.subr.mxu1 %v523_v4 }
 0x160   : > { %v2653_v10 = vadd.f32 %v1979_v8, %v551_v5  ;;  %822 = vmax.xlane.f32.xlu0 %v2649_v6  ;;  %v2742_v8 = vld [vmem:[#allocation3 + $0x20] sm:$0xff]  ;;  %2015 = vmatpush3.msra.mxu1 %v523_v4  ;;  %v2811_v4 = vld [vmem:[#allocation3 + $0x70] sm:$0xff] }
 0x161   : > { %v737_v11 = vpop.f32.mrf.mxu0 }
 0x162   : > { %828 = vmax.xlane.f32.xlu1 %v2653_v10  ;;  %v2659_v13 = vadd.f32 %v737_v11, %v550_v9  ;;  %v522_v9 = vld [vmem:[%s2528_s12 + $0x30] sm:$0xff] }
 0x163   : > { %v1982_v15 = vpop.f32.mrf.mxu0  ;;  %2016 = vmatprep.subr.mxu1 %v522_v9 }
 0x164   : > { %824 = vmax.xlane.f32.xlu0 %v2656_v12  ;;  %v2665_v18 = vadd.f32 %v1982_v15, %v553_v14  ;;  %v2751_v14 = vld [vmem:[#allocation3 + $0x28] sm:$0xff]  ;;  %2017 = vmatpush3.msra.mxu1 %v522_v9 }
 0x165   : > { %v747_v17 = vpop.f32.mrf.mxu0 }
 0x166   : > { %826 = vmax.xlane.f32.xlu1 %v2659_v13  ;;  %v2667_v19 = vadd.f32 %v747_v17, %v552_v16  ;;  %v521_v16 = vld [vmem:[%s2528_s12 + $0x28] sm:$0xff] }
 0x167   : > { %v1985_v21 = vpop.f32.mrf.mxu0  ;;  %2018 = vmatprep.subr.mxu1 %v521_v16 }
 0x168   : > { %830 = vmax.xlane.f32.xlu0 %v2667_v19  ;;  %v2673_v24 = vadd.f32 %v1985_v21, %v555_v20  ;;  %v2759_v21 = vld [vmem:[#allocation3 + $0x30] sm:$0xff]  ;;  %2019 = vmatpush3.msra.mxu1 %v521_v16 }
 0x169   : > { %v757_v23 = vpop.f32.mrf.mxu0 }
 0x16a   : > { %832 = vmax.xlane.f32.xlu1 %v2665_v18  ;;  %v2675_v25 = vadd.f32 %v757_v23, %v554_v22  ;;  %v520_v22 = vld [vmem:[%s2528_s12 + $0x20] sm:$0xff] }
 0x16b   : > { %v1988_v27 = vpop.f32.mrf.mxu0  ;;  %2020 = vmatprep.subr.mxu1 %v520_v22 }
 0x16c   : > { %834 = vmax.xlane.f32.xlu0 %v2675_v25  ;;  %v2681_v31 = vadd.f32 %v1988_v27, %v557_v26  ;;  %v2766_v26 = vld [vmem:[#allocation3 + $0x38] sm:$0xff]  ;;  %2021 = vmatpush3.msra.mxu1 %v520_v22 }
 0x16d   : > { %v767_v30 = vpop.f32.mrf.mxu0 }
 0x16e   : > { %836 = vmax.xlane.f32.xlu1 %v2673_v24  ;;  %v2683_v32 = vadd.f32 %v767_v30, %v556_v28  ;;  %v519_v28 = vld [vmem:[%s2528_s12 + $0x18] sm:$0xff] }
 0x16f   : > { %v1991_v34 = vpop.f32.mrf.mxu0  ;;  %2022 = vmatprep.subr.mxu1 %v519_v28 }
 0x170   : > { %838 = vmax.xlane.f32.xlu0 %v2683_v32  ;;  %v2689_v37 = vadd.f32 %v1991_v34, %v559_v33  ;;  %v2773_v33 = vld [vmem:[#allocation3 + $0x40] sm:$0xff]  ;;  %2023 = vmatpush3.msra.mxu1 %v519_v28  ;;  %v518_v34 = vld [vmem:[%s2528_s12 + $0x10] sm:$0xff] }
 0x171   : > { %v777_v36 = vpop.f32.mrf.mxu0  ;;  %2024 = vmatprep.subr.mxu1 %v518_v34 }
 0x172   : > { %840 = vmax.xlane.f32.xlu1 %v2681_v31  ;;  %v2691_v38 = vadd.f32 %v777_v36, %v558_v35  ;;  %2025 = vmatpush3.msra.mxu1 %v518_v34 }
 0x173   : > { %v1994_v40 = vpop.f32.mrf.mxu0 }
 0x174   : > { %842 = vmax.xlane.f32.xlu0 %v2691_v38  ;;  %v2697_v43 = vadd.f32 %v1994_v40, %v561_v39  ;;  %v2782_v39 = vld [vmem:[#allocation3 + $0x48] sm:$0xff] }
 0x175   : > { %v787_v42 = vpop.f32.mrf.mxu0 }
 0x176   : > { %844 = vmax.xlane.f32.xlu1 %v2689_v37  ;;  %v2699_v44 = vadd.f32 %v787_v42, %v560_v41  ;;  %v517_v41 = vld [vmem:[%s2528_s12 + $0x8] sm:$0xff] }
 0x177   : > { %v1997_v46 = vpop.f32.mrf.mxu0  ;;  %2026 = vmatprep.subr.mxu1 %v517_v41 }
 0x178   : > { %846 = vmax.xlane.f32.xlu0 %v2699_v44  ;;  %v2705_v49 = vadd.f32 %v1997_v46, %v563_v45  ;;  %v2789_v46 = vld [vmem:[#allocation3 + $0x50] sm:$0xff]  ;;  %2027 = vmatpush3.msra.mxu1 %v517_v41 }
 0x179   : > { %v797_v48 = vpop.f32.mrf.mxu0 }
 0x17a   : > { %848 = vmax.xlane.f32.xlu1 %v2697_v43  ;;  %v2707_v50 = vadd.f32 %v797_v48, %v562_v47  ;;  %v516_v47 = vld [vmem:[%s2528_s12] sm:$0xff] }
 0x17b   : > { %2028 = vmatprep.subr.mxu1 %v516_v47 }
 0x17c   : > { %850 = vmax.xlane.f32.xlu0 %v2707_v50  ;;  %2029 = vmatpush3.msra.mxu1 %v516_v47 }
 0x17e   : > { %852 = vmax.xlane.f32.xlu1 %v2705_v49 }
 0x1e9   : > { %v823_v58 = vpop.xlane.xlu0 %822 }
 0x1ea   : > { %v2723_v61 = vmax.f32 %v2716_v56, %v823_v58  ;;  %v2802_v58 = vld [vmem:[#allocation3 + $0x60] sm:$0xff] }
 0x1eb   : > { %v829_v62 = vpop.xlane.xlu1 %828 }
 0x1ec   : > { %1143 = vst.msk [vmem:[#allocation3] sm:$0xff] %vm1126_vm2, %v2723_v61  ;;  %v2731_v1 = vmax.f32 %v2719_v59, %v829_v62  ;;  %920 = vperm.xlu0 %2147, %v2723_v61   ;;  %v870_v35 = vsub.f32 %v2716_v56, %v2723_v61  ;;  %v819_v61 = vld [vmem:[#allocation3 + $0x68] sm:$0xff] }
 0x1ed   : > { %v825_v2 = vpop.xlane.xlu0 %824 }
 0x1ee   : > { %1146 = vst.msk [vmem:[#allocation3 + $0x18] sm:$0xff] %vm1126_vm2, %v2731_v1  ;;  %v2740_v5 = vmax.f32 %v2725_v63, %v825_v2  ;;  %v886_v48 = vmul.f32 1.442695, %v870_v35  ;;  %v873_v51 = vsub.f32 %v2719_v59, %v2731_v1 }
 0x1ef   : > { %v827_v7 = vpop.xlane.xlu1 %826 }
 0x1f0   : > { %1144 = vst.msk [vmem:[#allocation3 + $0x8] sm:$0xff] %vm1126_vm2, %v2740_v5  ;;  %v2748_v11 = vmax.f32 %v2734_v3, %v827_v7  ;;  %925 = vperm.xlu1 %2148, %v2740_v5   ;;  %2149 = vpow2.f32 %v886_v48  ;;  %v892_v59 = vmul.f32 1.442695, %v873_v51  ;;  %v871_v16 = vsub.f32 %v2725_v63, %v2740_v5 }
 0x1f1   : > { %v831_v15 = vpop.xlane.xlu0 %830 }
 0x1f2   : > { %1145 = vst.msk [vmem:[#allocation3 + $0x10] sm:$0xff] %vm1126_vm2, %v2748_v11  ;;  %v2757_v17 = vmax.f32 %v2742_v8, %v831_v15  ;;  %2151 = vpow2.f32 %v892_v59  ;;  %v888_v63 = vmul.f32 1.442695, %v871_v16  ;;  %v872_v5 = vsub.f32 %v2734_v3, %v2748_v11 }
 0x1f3   : > { %v833_v20 = vpop.xlane.xlu1 %832 }
 0x1f4   : > { %v859_v23 = vmax.f32 %v2751_v14, %v833_v20  ;;  %935 = vperm.xlu1 %2148, %v2731_v1   ;;  %1147 = vst.msk [vmem:[#allocation3 + $0x20] sm:$0xff] %vm1126_vm2, %v2757_v17  ;;  %v874_v3 = vsub.f32 %v2742_v8, %v2757_v17 }
 0x1f5   : > { %v835_v27 = vpop.xlane.xlu0 %834 }
 0x1f6   : > { %1148 = vst.msk [vmem:[#allocation3 + $0x28] sm:$0xff] %vm1126_vm2, %v859_v23  ;;  %v2771_v29 = vmax.f32 %v2759_v21, %v835_v27  ;;  %v875_v56 = vsub.f32 %v2751_v14, %v859_v23  ;;  %v2816_v14 = vld [vmem:[#allocation3 + $0x78] sm:$0xff] }
 0x1f7   : > { %v837_v30 = vpop.xlane.xlu1 %836 }
 0x1f8   : > { %v861_v36 = vmax.f32 %v2766_v26, %v837_v30  ;;  %930 = vperm.xlu1 %2148, %v2748_v11   ;;  %1149 = vst.msk [vmem:[#allocation3 + $0x30] sm:$0xff] %vm1126_vm2, %v2771_v29  ;;  %v896_v1 = vmul.f32 1.442695, %v875_v56  ;;  %v876_v47 = vsub.f32 %v2759_v21, %v2771_v29 }
 0x1f9   : > { %v839_v40 = vpop.xlane.xlu0 %838 }
 0x1fa   : > { %1150 = vst.msk [vmem:[#allocation3 + $0x38] sm:$0xff] %vm1126_vm2, %v861_v36  ;;  %v2787_v42 = vmax.f32 %v2773_v33, %v839_v40  ;;  %v877_v7 = vsub.f32 %v2766_v26, %v861_v36  ;;  %2153 = vpow2.f32 %v896_v1 }
 0x1fb   : > { %v841_v45 = vpop.xlane.xlu1 %840 }
 0x1fc   : > { %v863_v52 = vmax.f32 %v2782_v39, %v841_v45  ;;  %945 = vperm.xlu1 %2148, %v859_v23   ;;  %1151 = vst.msk [vmem:[#allocation3 + $0x40] sm:$0xff] %vm1126_vm2, %v2787_v42  ;;  %v900_v23 = vmul.f32 1.442695, %v877_v7  ;;  %v894_v45 = vmul.f32 1.442695, %v874_v3  ;;  %v878_v51 = vsub.f32 %v2773_v33, %v2787_v42 }
 0x1fd   : > { %v843_v54 = vpop.xlane.xlu0 %842 }
 0x1fe   : > { %1152 = vst.msk [vmem:[#allocation3 + $0x48] sm:$0xff] %vm1126_vm2, %v863_v52  ;;  %965 = vperm.xlu0 %2147, %v863_v52   ;;  %v2799_v55 = vmax.f32 %v2789_v46, %v843_v54  ;;  %v879_v26 = vsub.f32 %v2782_v39, %v863_v52  ;;  %2155 = vpow2.f32 %v900_v23  ;;  %v890_v39 = vmul.f32 1.442695, %v872_v5 }
 0x1ff   : > { %v845_v57 = vpop.xlane.xlu1 %844  ;;  %2157 = vpow2.f32 %v888_v63  ;;  %v902_v21 = vmul.f32 1.442695, %v878_v51 }
 0x200   : > { %v865_v60 = vmax.f32 %v817_v53, %v845_v57  ;;  %940 = vperm.xlu1 %2148, %v2757_v17   ;;  %1153 = vst.msk [vmem:[#allocation3 + $0x50] sm:$0xff] %vm1126_vm2, %v2799_v55  ;;  %v904_v34 = vmul.f32 1.442695, %v879_v26  ;;  %v898_v17 = vmul.f32 1.442695, %v876_v47 }
 0x201   : > { %v847_v62 = vpop.xlane.xlu0 %846 }
 0x202   : > { %1154 = vst.msk [vmem:[#allocation3 + $0x58] sm:$0xff] %vm1126_vm2, %v865_v60  ;;  %975 = vperm.xlu0 %2147, %v865_v60   ;;  %v2809_v0 = vmax.f32 %v2802_v58, %v847_v62  ;;  %v881_v35 = vsub.f32 %v817_v53, %v865_v60  ;;  %2159 = vpow2.f32 %v904_v34 }
 0x203   : > { %v849_v2 = vpop.xlane.xlu1 %848  ;;  %2161 = vpow2.f32 %v890_v39 }
 0x204   : > { %v867_v9 = vmax.f32 %v819_v61, %v849_v2  ;;  %955 = vperm.xlu1 %2148, %v861_v36   ;;  %1155 = vst.msk [vmem:[#allocation3 + $0x60] sm:$0xff] %vm1126_vm2, %v2809_v0  ;;  %v2841_v36 = vpop.eup %2149  ;;  %v908_v11 = vmul.f32 1.442695, %v881_v35 }
 0x205   : > { %v851_v15 = vpop.xlane.xlu0 %850  ;;  %v2847_v41 = vpop.eup %2151 }
 0x206   : > { %1156 = vst.msk [vmem:[#allocation3 + $0x68] sm:$0xff] %vm1126_vm2, %v867_v9  ;;  %985 = vperm.xlu0 %2147, %v867_v9   ;;  %v2822_v20 = vmax.f32 %v2811_v4, %v851_v15  ;;  %v883_v40 = vsub.f32 %v819_v61, %v867_v9  ;;  %2163 = vpow2.f32 %v908_v11 }
 0x207   : > { %v853_v22 = vpop.xlane.xlu1 %852  ;;  %v2852_v48 = vpop.eup %2153  ;;  %2165 = vpow2.f32 %v894_v45 }
 0x208   : > { %v2826_v27 = vmax.f32 %v2816_v14, %v853_v22  ;;  %950 = vperm.xlu1 %2148, %v2771_v29   ;;  %v884_v28 = vsub.f32 %v2811_v4, %v2822_v20  ;;  %1157 = vst.msk [vmem:[#allocation3 + $0x70] sm:$0xff] %vm1126_vm2, %v2822_v20  ;;  %v912_v8 = vmul.f32 1.442695, %v883_v40  ;;  %v880_v29 = vsub.f32 %v2789_v46, %v2799_v55 }
 0x20a   : > { %v885_v30 = vsub.f32 %v2816_v14, %v2826_v27  ;;  %1158 = vst.msk [vmem:[#allocation3 + $0x78] sm:$0xff] %vm1126_vm2, %v2826_v27  ;;  %995 = vperm.xlu0 %2147, %v2826_v27   ;;  %2167 = vpow2.f32 %v912_v8  ;;  %v906_v33 = vmul.f32 1.442695, %v880_v29 }
 0x20b   : > { %v2859_v52 = vpop.eup %2155  ;;  %2169 = vpow2.f32 %v898_v17 }
 0x20c   : > { %960 = vperm.xlu1 %2148, %v2787_v42   ;;  %v2864_v53 = vpop.eup %2157  ;;  %2171 = vpow2.f32 %v902_v21  ;;  %v882_v42 = vsub.f32 %v2802_v58, %v2809_v0 }
 0x20d   : > { %2173 = vpow2.f32 %v906_v33 }
 0x20e   : > { %1322 = vperm.xlu0 %2147, %v2841_v36  }
 0x20f   : > { %v2867_v54 = vpop.eup %2159 }
 0x210   : > { %970 = vperm.xlu1 %2148, %v2799_v55   ;;  %v2872_v56 = vpop.eup %2161  ;;  %v910_v55 = vmul.f32 1.442695, %v882_v42 }
 0x212   : > { %1337 = vperm.xlu0 %2147, %v2847_v41   ;;  %2175 = vpow2.f32 %v910_v55 }
 0x213   : > { %v2875_v46 = vpop.eup %2163 }
 0x214   : > { %980 = vperm.xlu1 %2148, %v2809_v0   ;;  %v2878_v57 = vpop.eup %2165 }
 0x216   : > { %1347 = vperm.xlu0 %2147, %v2852_v48  }
 0x217   : > { %v2881_v59 = vpop.eup %2167 }
 0x218   : > { %990 = vperm.xlu1 %2148, %v2822_v20   ;;  %v2884_v58 = vpop.eup %2169 }
 0x219   : > { %v2887_v60 = vpop.eup %2171 }
 0x21a   : > { %1357 = vperm.xlu0 %2147, %v2859_v52   ;;  %v2890_v61 = vpop.eup %2173 }
 0x21c   : > { %1327 = vperm.xlu1 %2148, %v2864_v53  }
 0x21e   : > { %1367 = vperm.xlu0 %2147, %v2867_v54  }
 0x21f   : > { %v2893_v62 = vpop.eup %2175 }
 0x220   : > { %1332 = vperm.xlu1 %2148, %v2872_v56  }
 0x222   : > { %1377 = vperm.xlu0 %2147, %v2875_v46  }
 0x224   : > { %1342 = vperm.xlu1 %2148, %v2878_v57  }
 0x226   : > { %1387 = vperm.xlu0 %2147, %v2881_v59  }
 0x228   : > { %1352 = vperm.xlu1 %2148, %v2884_v58  }
 0x22c   : > { %1362 = vperm.xlu1 %2148, %v2887_v60  }
 0x230   : > { %1372 = vperm.xlu1 %2148, %v2890_v61  }
 0x234   : > { %1382 = vperm.xlu1 %2148, %v2893_v62  }
 0x267   : > { %v921_v0 = vpop.permute.xlu0 %920 }
 0x268   : > { %v998_v1 = vsub.f32 %v2649_v6, %v921_v0 }
 0x26a   : > { %v1014_v2 = vmul.f32 1.442695, %v998_v1 }
 0x26b   : > { %v926_v7 = vpop.permute.xlu1 %925 }
 0x26c   : > { %2177 = vpow2.f32 %v1014_v2  ;;  %v999_v9 = vsub.f32 %v2656_v12, %v926_v7 }
 0x26e   : > { %v1016_v15 = vmul.f32 1.442695, %v999_v9 }
 0x26f   : > { %v936_v16 = vpop.permute.xlu1 %935 }
 0x270   : > { %2179 = vpow2.f32 %v1016_v15  ;;  %v1001_v22 = vsub.f32 %v2653_v10, %v936_v16 }
 0x272   : > { %v1020_v23 = vmul.f32 1.442695, %v1001_v22 }
 0x273   : > { %v931_v26 = vpop.permute.xlu1 %930 }
 0x274   : > { %2181 = vpow2.f32 %v1020_v23  ;;  %v1000_v63 = vsub.f32 %v2659_v13, %v931_v26 }
 0x276   : > { %v1018_v5 = vmul.f32 1.442695, %v1000_v63 }
 0x277   : > { %v946_v34 = vpop.permute.xlu1 %945 }
 0x278   : > { %2183 = vpow2.f32 %v1018_v5  ;;  %v1003_v6 = vsub.f32 %v2665_v18, %v946_v34 }
 0x279   : > { %v2178_v35 = vpop.eup %2177  ;;  %v966_v39 = vpop.permute.xlu0 %965 }
 0x27a   : > { %v1024_v3 = vmul.f32 1.442695, %v1003_v6  ;;  %1078 = vadd.xlane.f32.xlu1 %v2178_v35  ;;  %2030 = vmatprep.mubr.f32.mxu1 %v2178_v35  ;;  %v1007_v18 = vsub.f32 %v2681_v31, %v966_v39 }
 0x27b   : > { %v941_v12 = vpop.permute.xlu1 %940 }
 0x27c   : > { %2185 = vpow2.f32 %v1024_v3  ;;  %v1002_v11 = vsub.f32 %v2667_v19, %v941_v12  ;;  %v1032_v33 = vmul.f32 1.442695, %v1007_v18 }
 0x27d   : > { %v2180_v10 = vpop.eup %2179  ;;  %v976_v45 = vpop.permute.xlu0 %975 }
 0x27e   : > { %v1022_v40 = vmul.f32 1.442695, %v1002_v11  ;;  %1080 = vadd.xlane.f32.xlu0 %v2180_v10  ;;  %2031 = vmatmul.mubr.f32.vlgmr.msra.gmra.mxu1 %v2180_v10  ;;  %v1009_v42 = vsub.f32 %v2689_v37, %v976_v45  ;;  %v914_v10 = vmul.f32 1.442695, %v884_v28  ;;  %v916_v45 = vmul.f32 1.442695, %v885_v30 }
 0x27f   : > { %v956_v13 = vpop.permute.xlu1 %955 }
 0x280   : > { %2187 = vpow2.f32 %v1022_v40  ;;  %v1005_v47 = vsub.f32 %v2673_v24, %v956_v13  ;;  %v1036_v1 = vmul.f32 1.442695, %v1009_v42 }
 0x281   : > { %v2182_v8 = vpop.eup %2181  ;;  %v986_v21 = vpop.permute.xlu0 %985 }
 0x282   : > { %v1028_v17 = vmul.f32 1.442695, %v1005_v47  ;;  %1084 = vadd.xlane.f32.xlu1 %v2182_v8  ;;  %v1011_v2 = vsub.f32 %v2697_v43, %v986_v21 }
 0x283   : > { %v951_v51 = vpop.permute.xlu1 %950 }
 0x284   : > { %2189 = vpow2.f32 %v1028_v17  ;;  %v1004_v29 = vsub.f32 %v2675_v25, %v951_v51  ;;  %v1040_v16 = vmul.f32 1.442695, %v1011_v2 }
 0x285   : > { %v2184_v19 = vpop.eup %2183  ;;  %v996_v7 = vpop.permute.xlu0 %995 }
 0x286   : > { %v1026_v55 = vmul.f32 1.442695, %v1004_v29  ;;  %1082 = vadd.xlane.f32.xlu0 %v2184_v19  ;;  %2033 = vmatprep.mubr.f32.mxu1 %v2184_v19  ;;  %v1013_v22 = vsub.f32 %v2705_v49, %v996_v7  ;;  %v1049_v7 = vld [vmem:[#allocation4 + $0x18] sm:$0xff] }
 0x287   : > { %v961_v0 = vpop.permute.xlu1 %960  ;;  %2034 = vmatmul.mubr.f32.gmra.mxu1 %v2182_v8 }
 0x288   : > { %2191 = vpow2.f32 %v1026_v55  ;;  %v1006_v24 = vsub.f32 %v2683_v32, %v961_v0  ;;  %v1044_v63 = vmul.f32 1.442695, %v1013_v22 }
 0x289   : > { %v2186_v31 = vpop.eup %2185  ;;  %2193 = vpow2.f32 %v1032_v33  ;;  %v2926_v28 = vpop.permute.xlu0 %1322  ;;  %v1046_v33 = vld [vmem:[#allocation4] sm:$0xff] }
 0x28a   : > { %v1030_v9 = vmul.f32 1.442695, %v1006_v24  ;;  %1088 = vadd.xlane.f32.xlu1 %v2186_v31  ;;  %v1062_v42 = vmul.f32 %v2841_v36, %v1046_v33  ;;  %v1047_v24 = vld [vmem:[#allocation4 + $0x8] sm:$0xff]  ;;  %v1056_v33 = vld [vmem:[#allocation4 + $0x50] sm:$0xff] }
 0x28b   : > { %v971_v25 = vpop.permute.xlu1 %970 }
 0x28c   : > { %2195 = vpow2.f32 %v1030_v9  ;;  %v1008_v37 = vsub.f32 %v2691_v38, %v971_v25  ;;  %v1065_v25 = vmul.f32 %v2847_v41, %v1049_v7 }
 0x28d   : > { %v2188_v15 = vpop.eup %2187  ;;  %2197 = vpow2.f32 %v1036_v1  ;;  %v2930_v8 = vpop.permute.xlu0 %1337  ;;  %v1063_v1 = vmul.f32 %v2864_v53, %v1047_v24  ;;  %v1072_v24 = vmul.f32 %v2890_v61, %v1056_v33  ;;  %v1060_v61 = vld [vmem:[#allocation4 + $0x70] sm:$0xff]  ;;  %v1312_v33 = vld [vmem:[#allocation2 + $0x40] sm:$0xff] }
 0x28e   : > { %v1034_v23 = vmul.f32 1.442695, %v1008_v37  ;;  %1086 = vadd.xlane.f32.xlu0 %v2188_v15  ;;  %2036 = vmatprep.mubr.f32.mxu1 %v2188_v15  ;;  %v1048_v15 = vld [vmem:[#allocation4 + $0x10] sm:$0xff] }
 0x28f   : > { %v981_v32 = vpop.permute.xlu1 %980  ;;  %2037 = vmatmul.mubr.f32.gmra.mxu1 %v2186_v31  ;;  %v1064_v36 = vmul.f32 %v2872_v56, %v1048_v15 }
 0x290   : > { %2199 = vpow2.f32 %v1034_v23  ;;  %v1010_v43 = vsub.f32 %v2699_v44, %v981_v32  ;;  %v1051_v23 = vld [vmem:[#allocation4 + $0x28] sm:$0xff] }
 0x291   : > { %v2190_v26 = vpop.eup %2189  ;;  %2201 = vpow2.f32 %v1040_v16  ;;  %v2934_v14 = vpop.permute.xlu0 %1347  ;;  %v1067_v53 = vmul.f32 %v2852_v48, %v1051_v23 }
 0x292   : > { %v1038_v5 = vmul.f32 1.442695, %v1010_v43  ;;  %1092 = vadd.xlane.f32.xlu1 %v2190_v26 }
 0x293   : > { %v991_v34 = vpop.permute.xlu1 %990 }
 0x294   : > { %2203 = vpow2.f32 %v1038_v5  ;;  %v1012_v38 = vsub.f32 %v2707_v50, %v991_v34  ;;  %v1053_v34 = vld [vmem:[#allocation4 + $0x38] sm:$0xff] }
 0x295   : > { %v2192_v6 = vpop.eup %2191  ;;  %2205 = vpow2.f32 %v1044_v63  ;;  %v2938_v30 = vpop.permute.xlu0 %1357  ;;  %v1069_v56 = vmul.f32 %v2859_v52, %v1053_v34  ;;  %v1307_v34 = vld [vmem:[#allocation2 + $0x18] sm:$0xff] }
 0x296   : > { %v2194_v49 = vpop.eup %2193  ;;  %v1042_v35 = vmul.f32 1.442695, %v1012_v38  ;;  %1090 = vadd.xlane.f32.xlu0 %v2192_v6  ;;  %2039 = vmatprep.mubr.f32.mxu1 %v2192_v6 }
 0x297   : > { %1096 = vadd.xlane.f32.xlu1 %v2194_v49  ;;  %2040 = vmatmul.mubr.f32.gmra.mxu1 %v2190_v26  ;;  %v2924_v20 = vpop.permute.xlu1 %1327  ;;  %v1050_v26 = vld [vmem:[#allocation4 + $0x20] sm:$0xff] }
 0x298   : > { %2207 = vpow2.f32 %v1042_v35  ;;  %v1066_v41 = vmul.f32 %v2878_v57, %v1050_v26 }
 0x299   : > { %v2196_v39 = vpop.eup %2195  ;;  %2209 = vpow2.f32 %v914_v10  ;;  %v2942_v51 = vpop.permute.xlu0 %1367 }
 0x29a   : > { %v2198_v44 = vpop.eup %2197  ;;  %1094 = vadd.xlane.f32.xlu0 %v2196_v39  ;;  %2042 = vmatprep.mubr.f32.mxu1 %v2196_v39  ;;  %2211 = vpow2.f32 %v916_v45  ;;  %v1055_v39 = vld [vmem:[#allocation4 + $0x48] sm:$0xff] }
 0x29b   : > { %1100 = vadd.xlane.f32.xlu1 %v2198_v44  ;;  %2043 = vmatmul.mubr.f32.gmra.mxu1 %v2194_v49  ;;  %v2928_v47 = vpop.permute.xlu1 %1332  ;;  %v1052_v49 = vld [vmem:[#allocation4 + $0x30] sm:$0xff] }
 0x29c   : > { %v1068_v48 = vmul.f32 %v2884_v58, %v1052_v49 }
 0x29d   : > { %v2200_v3 = vpop.eup %2199  ;;  %v2946_v29 = vpop.permute.xlu0 %1377 }
 0x29e   : > { %v2202_v12 = vpop.eup %2201  ;;  %1098 = vadd.xlane.f32.xlu0 %v2200_v3  ;;  %2045 = vmatprep.mubr.f32.mxu1 %v2200_v3 }
 0x29f   : > { %1104 = vadd.xlane.f32.xlu1 %v2202_v12  ;;  %2046 = vmatmul.mubr.f32.gmra.mxu1 %v2198_v44  ;;  %v2932_v18 = vpop.permute.xlu1 %1342  ;;  %v1071_v44 = vmul.f32 %v2867_v54, %v1055_v39 }
 0x2a1   : > { %v2204_v50 = vpop.eup %2203  ;;  %v2951_v55 = vpop.permute.xlu0 %1387 }
 0x2a2   : > { %v2206_v11 = vpop.eup %2205  ;;  %1102 = vadd.xlane.f32.xlu0 %v2204_v50  ;;  %2048 = vmatprep.mubr.f32.mxu1 %v2204_v50 }
 0x2a3   : > { %1108 = vadd.xlane.f32.xlu1 %v2206_v11  ;;  %2049 = vmatmul.mubr.f32.gmra.mxu1 %v2202_v12  ;;  %v2936_v27 = vpop.permute.xlu1 %1352  ;;  %v1054_v12 = vld [vmem:[#allocation4 + $0x40] sm:$0xff] }
 0x2a4   : > { %v1070_v52 = vmul.f32 %v2887_v60, %v1054_v12  ;;  %v1058_v60 = vld [vmem:[#allocation4 + $0x60] sm:$0xff] }
 0x2a5   : > { %v2208_v40 = vpop.eup %2207 }
 0x2a6   : > { %1106 = vadd.xlane.f32.xlu0 %v2208_v40  ;;  %2051 = vmatprep.mubr.f32.mxu1 %v2208_v40  ;;  %v2918_v13 = vpop.eup %2209 }
 0x2a7   : > { %2052 = vmatmul.mubr.f32.gmra.mxu1 %v2206_v11  ;;  %v2921_v4 = vpop.eup %2211  ;;  %v2940_v17 = vpop.permute.xlu1 %1362  ;;  %v1057_v11 = vld [vmem:[#allocation4 + $0x58] sm:$0xff] }
 0x2a8   : > { %v1073_v40 = vmul.f32 %v2875_v46, %v1057_v11  ;;  %v1310_v11 = vld [vmem:[#allocation2 + $0x8] sm:$0xff] }
 0x2ab   : > { %v2944_v21 = vpop.permute.xlu1 %1372 }
 0x2af   : > { %v2948_v19 = vpop.permute.xlu1 %1382 }
 0x2b4   : > { %1392 = vperm.xlu1 %2148, %v2918_v13  }
 0x2bc   : > { %1397 = vperm.xlu0 %2147, %v2921_v4  }
 0x303   : > { %v1079_v0 = vpop.xlane.xlu1 %1078 }
 0x304   : > { %v1110_v31 = vadd.f32 %v1079_v0, %v1062_v42  ;;  %v1059_v0 = vld [vmem:[#allocation4 + $0x68] sm:$0xff] }
 0x306   : > { %1127 = vst.msk [vmem:[#allocation4] sm:$0xff] %vm1126_vm2, %v1110_v31  ;;  %v1075_v31 = vmul.f32 %v2881_v59, %v1059_v0  ;;  %v1076_v59 = vmul.f32 %v2918_v13, %v1060_v61  ;;  %v1306_v13 = vld [vmem:[#allocation2 + $0x58] sm:$0xff] }
 0x307   : > { %v1081_v2 = vpop.xlane.xlu0 %1080 }
 0x308   : > { %v1111_v9 = vadd.f32 %v1081_v2, %v1063_v1 }
 0x30a   : > { %1128 = vst.msk [vmem:[#allocation4 + $0x8] sm:$0xff] %vm1126_vm2, %v1111_v9  ;;  %v1061_v9 = vld [vmem:[#allocation4 + $0x78] sm:$0xff] }
 0x30b   : > { %v1085_v37 = vpop.xlane.xlu1 %1084 }
 0x30c   : > { %v1113_v16 = vadd.f32 %v1085_v37, %v1065_v25  ;;  %v1074_v25 = vmul.f32 %v2893_v62, %v1058_v60  ;;  %v1077_v37 = vmul.f32 %v2921_v4, %v1061_v9  ;;  %v1305_v62 = vld [vmem:[#allocation2] sm:$0xff] }
 0x30d   : > { %v1316_v9 = vld [vmem:[#allocation2 + $0x60] sm:$0xff] }
 0x30e   : > { %1130 = vst.msk [vmem:[#allocation4 + $0x18] sm:$0xff] %vm1126_vm2, %v1113_v16 }
 0x30f   : > { %v1083_v22 = vpop.xlane.xlu0 %1082 }
 0x310   : > { %v1112_v32 = vadd.f32 %v1083_v22, %v1064_v36 }
 0x312   : > { %1129 = vst.msk [vmem:[#allocation4 + $0x10] sm:$0xff] %vm1126_vm2, %v1112_v32 }
 0x313   : > { %v1089_v43 = vpop.xlane.xlu1 %1088 }
 0x314   : > { %v1115_v63 = vadd.f32 %v1089_v43, %v1067_v53  ;;  %v1304_v53 = vld [vmem:[#allocation2 + $0x30] sm:$0xff]  ;;  %v1401_v43 = vmul.f32 %v2924_v20, %v1305_v62  ;;  %v1309_v20 = vld [vmem:[#allocation2 + $0x68] sm:$0xff] }
 0x315   : > { %v1400_v26 = vmul.f32 %v2926_v28, %v1304_v53  ;;  %v1405_v28 = vmul.f32 %v2934_v14, %v1309_v20 }
 0x316   : > { %1132 = vst.msk [vmem:[#allocation4 + $0x28] sm:$0xff] %vm1126_vm2, %v1115_v63 }
 0x317   : > { %v1087_v5 = vpop.xlane.xlu0 %1086 }
 0x318   : > { %v1114_v38 = vadd.f32 %v1087_v5, %v1066_v41 }
 0x31a   : > { %1131 = vst.msk [vmem:[#allocation4 + $0x20] sm:$0xff] %vm1126_vm2, %v1114_v38  ;;  %v1403_v38 = vmul.f32 %v2930_v8, %v1307_v34  ;;  %v1311_v8 = vld [vmem:[#allocation2 + $0x48] sm:$0xff] }
 0x31b   : > { %v1093_v6 = vpop.xlane.xlu1 %1092 }
 0x31c   : > { %v1117_v35 = vadd.f32 %v1093_v6, %v1069_v56  ;;  %v1402_v6 = vmul.f32 %v2928_v47, %v1306_v13  ;;  %v1407_v47 = vmul.f32 %v2938_v30, %v1311_v8 }
 0x31e   : > { %1134 = vst.msk [vmem:[#allocation4 + $0x38] sm:$0xff] %vm1126_vm2, %v1117_v35 }
 0x31f   : > { %v1091_v3 = vpop.xlane.xlu0 %1090 }
 0x320   : > { %v1097_v57 = vpop.xlane.xlu1 %1096  ;;  %v1116_v50 = vadd.f32 %v1091_v3, %v1068_v48  ;;  %v1308_v48 = vld [vmem:[#allocation2 + $0x50] sm:$0xff] }
 0x321   : > { %v1119_v10 = vadd.f32 %v1097_v57, %v1071_v44  ;;  %v1404_v3 = vmul.f32 %v2932_v18, %v1308_v48 }
 0x322   : > { %1133 = vst.msk [vmem:[#allocation4 + $0x30] sm:$0xff] %vm1126_vm2, %v1116_v50 }
 0x323   : > { %1136 = vst.msk [vmem:[#allocation4 + $0x48] sm:$0xff] %vm1126_vm2, %v1119_v10  ;;  %v1095_v45 = vpop.xlane.xlu0 %1094  ;;  %v1313_v10 = vld [vmem:[#allocation2 + $0x20] sm:$0xff] }
 0x324   : > { %v1101_v42 = vpop.xlane.xlu1 %1100  ;;  %v1118_v58 = vadd.f32 %v1095_v45, %v1070_v52  ;;  %v1409_v14 = vmul.f32 %v2942_v51, %v1313_v10 }
 0x325   : > { %v1121_v54 = vadd.f32 %v1101_v42, %v1073_v40  ;;  %v1406_v40 = vmul.f32 %v2936_v27, %v1310_v11  ;;  %v1317_v27 = vld [vmem:[#allocation2 + $0x70] sm:$0xff] }
 0x326   : > { %1135 = vst.msk [vmem:[#allocation4 + $0x40] sm:$0xff] %vm1126_vm2, %v1118_v58  ;;  %v1315_v58 = vld [vmem:[#allocation2 + $0x38] sm:$0xff] }
 0x327   : > { %1138 = vst.msk [vmem:[#allocation4 + $0x58] sm:$0xff] %vm1126_vm2, %v1121_v54  ;;  %v1099_v1 = vpop.xlane.xlu0 %1098  ;;  %v1408_v54 = vmul.f32 %v2940_v17, %v1312_v33  ;;  %v1411_v30 = vmul.f32 %v2946_v29, %v1315_v58 }
 0x328   : > { %v1105_v2 = vpop.xlane.xlu1 %1104  ;;  %v1120_v7 = vadd.f32 %v1099_v1, %v1072_v24 }
 0x329   : > { %v1123_v46 = vadd.f32 %v1105_v2, %v1075_v31  ;;  %v1314_v31 = vld [vmem:[#allocation2 + $0x10] sm:$0xff] }
 0x32a   : > { %1137 = vst.msk [vmem:[#allocation4 + $0x50] sm:$0xff] %vm1126_vm2, %v1120_v7  ;;  %v1410_v7 = vmul.f32 %v2944_v21, %v1314_v31 }
 0x32b   : > { %1140 = vst.msk [vmem:[#allocation4 + $0x68] sm:$0xff] %vm1126_vm2, %v1123_v46  ;;  %v1103_v15 = vpop.xlane.xlu0 %1102 }
 0x32c   : > { %v1109_v16 = vpop.xlane.xlu1 %1108  ;;  %v1122_v36 = vadd.f32 %v1103_v15, %v1074_v25  ;;  %v1413_v25 = vmul.f32 %v2951_v55, %v1317_v27 }
 0x32d   : > { %v1125_v22 = vadd.f32 %v1109_v16, %v1077_v37  ;;  %v1319_v37 = vld [vmem:[#allocation2 + $0x28] sm:$0xff]  ;;  %v1412_v16 = vmul.f32 %v2948_v19, %v1316_v9 }
 0x32e   : > { %1139 = vst.msk [vmem:[#allocation4 + $0x60] sm:$0xff] %vm1126_vm2, %v1122_v36  ;;  %v1318_v36 = vld [vmem:[#allocation2 + $0x78] sm:$0xff] }
 0x32f   : > { %1142 = vst.msk [vmem:[#allocation4 + $0x78] sm:$0xff] %vm1126_vm2, %v1125_v22  ;;  %v1107_v23 = vpop.xlane.xlu0 %1106 }
 0x330   : > { %v1124_v32 = vadd.f32 %v1107_v23, %v1076_v59  ;;  %v1393_v22 = vpop.permute.xlu1 %1392 }
 0x331   : > { %v1414_v62 = vmul.f32 %v1393_v22, %v1318_v36 }
 0x332   : > { %1141 = vst.msk [vmem:[#allocation4 + $0x70] sm:$0xff] %vm1126_vm2, %v1124_v32 }
 0x337   : > { %v1398_v15 = vpop.permute.xlu0 %1397 }
 0x338   : > { %v1415_v23 = vmul.f32 %v1398_v15, %v1319_v37 }
 0x33e   : > { %v2032_v4 = vpop.f32.mrf.mxu1 }
 0x33f   : > { %v1417_v63 = vadd.f32 %v2032_v4, %v1401_v43 }
 0x340   : > { %v1225_v41 = vpop.f32.mrf.mxu1 }
 0x341   : > { %1433 = vst [vmem:[#allocation2] sm:$0xff] %v1417_v63  ;;  %v1416_v5 = vadd.f32 %v1400_v26, %v1225_v41 }
 0x343   : > { %1432 = vst [vmem:[#allocation2 + $0x30] sm:$0xff] %v1416_v5 }
 0x347   : > { %v2035_v56 = vpop.f32.mrf.mxu1 }
 0x348   : > { %v1419_v49 = vadd.f32 %v2035_v56, %v1403_v38 }
 0x349   : > { %v1235_v35 = vpop.f32.mrf.mxu1 }
 0x34a   : > { %1435 = vst [vmem:[#allocation2 + $0x18] sm:$0xff] %v1419_v49  ;;  %v1418_v39 = vadd.f32 %v1402_v6, %v1235_v35 }
 0x34c   : > { %1434 = vst [vmem:[#allocation2 + $0x58] sm:$0xff] %v1418_v39 }
 0x34f   : > { %v2038_v44 = vpop.f32.mrf.mxu1 }
 0x350   : > { %v1421_v12 = vadd.f32 %v2038_v44, %v1405_v28 }
 0x351   : > { %v1245_v57 = vpop.f32.mrf.mxu1 }
 0x352   : > { %1437 = vst [vmem:[#allocation2 + $0x68] sm:$0xff] %v1421_v12  ;;  %v1420_v50 = vadd.f32 %v1404_v3, %v1245_v57 }
 0x354   : > { %1436 = vst [vmem:[#allocation2 + $0x50] sm:$0xff] %v1420_v50 }
 0x357   : > { %v2041_v52 = vpop.f32.mrf.mxu1 }
 0x358   : > { %v1423_v45 = vadd.f32 %v2041_v52, %v1407_v47 }
 0x359   : > { %v1255_v42 = vpop.f32.mrf.mxu1 }
 0x35a   : > { %1439 = vst [vmem:[#allocation2 + $0x48] sm:$0xff] %v1423_v45  ;;  %v1422_v18 = vadd.f32 %v1406_v40, %v1255_v42 }
 0x35b   : > { %v2044_v0 = vpop.f32.mrf.mxu1 }
 0x35c   : > { %1438 = vst [vmem:[#allocation2 + $0x8] sm:$0xff] %v1422_v18  ;;  %v1425_v24 = vadd.f32 %v2044_v0, %v1409_v14 }
 0x35d   : > { %v1265_v1 = vpop.f32.mrf.mxu1 }
 0x35e   : > { %1441 = vst [vmem:[#allocation2 + $0x20] sm:$0xff] %v1425_v24  ;;  %v1424_v60 = vadd.f32 %v1408_v54, %v1265_v1 }
 0x35f   : > { %v2047_v2 = vpop.f32.mrf.mxu1 }
 0x360   : > { %1440 = vst [vmem:[#allocation2 + $0x40] sm:$0xff] %v1424_v60  ;;  %v1427_v51 = vadd.f32 %v2047_v2, %v1411_v30 }
 0x361   : > { %v1275_v46 = vpop.f32.mrf.mxu1 }
 0x362   : > { %1443 = vst [vmem:[#allocation2 + $0x38] sm:$0xff] %v1427_v51  ;;  %v1426_v17 = vadd.f32 %v1410_v7, %v1275_v46 }
 0x363   : > { %v2050_v61 = vpop.f32.mrf.mxu1 }
 0x364   : > { %1442 = vst [vmem:[#allocation2 + $0x10] sm:$0xff] %v1426_v17  ;;  %v1429_v29 = vadd.f32 %v2050_v61, %v1413_v25 }
 0x365   : > { %v1285_v59 = vpop.f32.mrf.mxu1 }
 0x366   : > { %1445 = vst [vmem:[#allocation2 + $0x70] sm:$0xff] %v1429_v29  ;;  %v1428_v21 = vadd.f32 %v1412_v16, %v1285_v59 }
 0x367   : > { %v2053_v32 = vpop.f32.mrf.mxu1 }
 0x368   : > { %1444 = vst [vmem:[#allocation2 + $0x60] sm:$0xff] %v1428_v21  ;;  %v1431_v53 = vadd.f32 %v2053_v32, %v1415_v23  ;;  %1451 = sbr.rel (%p1870_p6) target bundleno = 1054 (0x41e), region = 82 }
 0x369   : > { %v1295_v55 = vpop.f32.mrf.mxu1 }
 0x36a   : > { %1447 = vst [vmem:[#allocation2 + $0x28] sm:$0xff] %v1431_v53  ;;  %v1430_v43 = vadd.f32 %v1414_v62, %v1295_v55 }
 0x36c   : > { %1446 = vst [vmem:[#allocation2 + $0x78] sm:$0xff] %v1430_v43 }
 0x36d   : > { %v1454_v19 = vld [vmem:[#allocation4 + $0x10] sm:$0xff]  ;;  %v1452_v4 = vld [vmem:[#allocation4] sm:$0xff]  ;;  %v1455_v26 = vld [vmem:[#allocation4 + $0x18] sm:$0xff]  ;;  %v2360_v63 = vmov 0  }
 0x36e   : > { %2214 = vset.pattern.permute.xlu1 %v2360_v63  ;;  %2213 = vset.pattern.permute.xlu0 %v2360_v63  ;;  %2215 = vrcp.f32 %v1454_v19  ;;  %v1453_v41 = vld [vmem:[#allocation4 + $0x8] sm:$0xff]  ;;  %v1456_v34 = vld [vmem:[#allocation4 + $0x20] sm:$0xff]  ;;  %v1459_v13 = vld [vmem:[#allocation4 + $0x38] sm:$0xff] }
 0x36f   : > { %2217 = vrcp.f32 %v1452_v4  ;;  %v1457_v5 = vld [vmem:[#allocation4 + $0x28] sm:$0xff]  ;;  %v1458_v38 = vld [vmem:[#allocation4 + $0x30] sm:$0xff]  ;;  %v1460_v6 = vld [vmem:[#allocation4 + $0x40] sm:$0xff] }
 0x370   : > { %2219 = vrcp.f32 %v1455_v26  ;;  %v1461_v56 = vld [vmem:[#allocation4 + $0x48] sm:$0xff]  ;;  %v1463_v49 = vld [vmem:[#allocation4 + $0x58] sm:$0xff]  ;;  %v1462_v35 = vld [vmem:[#allocation4 + $0x50] sm:$0xff] }
 0x371   : > { %2221 = vrcp.f32 %v1453_v41  ;;  %v1465_v20 = vld [vmem:[#allocation4 + $0x68] sm:$0xff]  ;;  %v1464_v44 = vld [vmem:[#allocation4 + $0x60] sm:$0xff]  ;;  %v1467_v52 = vld [vmem:[#allocation4 + $0x78] sm:$0xff] }
 0x372   : > { %2223 = vrcp.f32 %v1457_v5  ;;  %v1466_v14 = vld [vmem:[#allocation4 + $0x70] sm:$0xff] }
 0x373   : > { %2225 = vrcp.f32 %v1456_v34 }
 0x374   : > { %2227 = vrcp.f32 %v1459_v13 }
 0x375   : > { %2229 = vrcp.f32 %v1458_v38 }
 0x376   : > { %2231 = vrcp.f32 %v1461_v56 }
 0x377   : > { %2233 = vrcp.f32 %v1460_v6 }
 0x378   : > { %2235 = vrcp.f32 %v1463_v49 }
 0x379   : > { %2237 = vrcp.f32 %v1462_v35 }
 0x37a   : > { %2239 = vrcp.f32 %v1465_v20 }
 0x37b   : > { %v2216_v39 = vpop.eup %2215  ;;  %2241 = vrcp.f32 %v1464_v44 }
 0x37c   : > { %v2218_v48 = vpop.eup %2217  ;;  %v1486_v28 = vmul.f32 %v2216_v39, %v1454_v19  ;;  %2243 = vrcp.f32 %v1467_v52 }
 0x37d   : > { %v2220_v3 = vpop.eup %2219  ;;  %v1484_v12 = vmul.f32 %v2218_v48, %v1452_v4  ;;  %2245 = vrcp.f32 %v1466_v14 }
 0x37e   : > { %v2222_v57 = vpop.eup %2221  ;;  %v1502_v50 = vsub.f32 2.0, %v1486_v28  ;;  %v1487_v8 = vmul.f32 %v2220_v3, %v1455_v26 }
 0x37f   : > { %v2224_v11 = vpop.eup %2223  ;;  %v1500_v47 = vsub.f32 2.0, %v1484_v12  ;;  %v1485_v10 = vmul.f32 %v2222_v57, %v1453_v41 }
 0x380   : > { %v2226_v40 = vpop.eup %2225  ;;  %v1518_v45 = vmul.f32 %v2216_v39, %v1502_v50  ;;  %v1503_v33 = vsub.f32 2.0, %v1487_v8  ;;  %v1489_v42 = vmul.f32 %v2224_v11, %v1457_v5 }
 0x381   : > { %v2228_v18 = vpop.eup %2227  ;;  %v1516_v58 = vmul.f32 %v2218_v48, %v1500_v47  ;;  %v1501_v0 = vsub.f32 2.0, %v1485_v10  ;;  %v1488_v54 = vmul.f32 %v2226_v40, %v1456_v34  ;;  %v1533_v47 = vld [vmem:[#allocation2] sm:$0xff] }
 0x382   : > { %v2230_v24 = vpop.eup %2229  ;;  %1560 = vperm.xlu1 %2214, %v1518_v45   ;;  %v1519_v31 = vmul.f32 %v2220_v3, %v1503_v33  ;;  %v1505_v1 = vsub.f32 2.0, %v1489_v42  ;;  %v1491_v30 = vmul.f32 %v2228_v18, %v1459_v13  ;;  %v1532_v3 = vld [vmem:[#allocation2 + $0x30] sm:$0xff]  ;;  %v1537_v33 = vld [vmem:[#allocation2 + $0x68] sm:$0xff] }
 0x383   : > { %v2232_v60 = vpop.eup %2231  ;;  %1550 = vperm.xlu0 %2213, %v1516_v58   ;;  %v1517_v27 = vmul.f32 %v2222_v57, %v1501_v0  ;;  %v1504_v2 = vsub.f32 2.0, %v1488_v54  ;;  %v1490_v7 = vmul.f32 %v2230_v24, %v1458_v38  ;;  %v1536_v42 = vld [vmem:[#allocation2 + $0x50] sm:$0xff]  ;;  %v1539_v54 = vld [vmem:[#allocation2 + $0x48] sm:$0xff] }
 0x384   : > { %v2234_v51 = vpop.eup %2233  ;;  %v1521_v9 = vmul.f32 %v2224_v11, %v1505_v1  ;;  %v1507_v46 = vsub.f32 2.0, %v1491_v30  ;;  %v1493_v25 = vmul.f32 %v2232_v60, %v1461_v56  ;;  %v1535_v11 = vld [vmem:[#allocation2 + $0x18] sm:$0xff] }
 0x385   : > { %v2236_v17 = vpop.eup %2235  ;;  %v1520_v37 = vmul.f32 %v2226_v40, %v1504_v2  ;;  %v1506_v15 = vsub.f32 2.0, %v1490_v7  ;;  %v1492_v61 = vmul.f32 %v2234_v51, %v1460_v6  ;;  %v1540_v2 = vld [vmem:[#allocation2 + $0x40] sm:$0xff] }
 0x386   : > { %1565 = vperm.xlu1 %2214, %v1519_v31   ;;  %v2238_v16 = vpop.eup %2237  ;;  %v1523_v29 = vmul.f32 %v2228_v18, %v1507_v46  ;;  %v1509_v36 = vsub.f32 2.0, %v1493_v25  ;;  %v1495_v22 = vmul.f32 %v2236_v17, %v1463_v49  ;;  %v1543_v25 = vld [vmem:[#allocation2 + $0x38] sm:$0xff] }
 0x387   : > { %1555 = vperm.xlu0 %2213, %v1517_v27   ;;  %v2240_v59 = vpop.eup %2239  ;;  %v1522_v23 = vmul.f32 %v2230_v24, %v1506_v15  ;;  %v1508_v21 = vsub.f32 2.0, %v1492_v61  ;;  %v1494_v32 = vmul.f32 %v2238_v16, %v1462_v35  ;;  %v1538_v24 = vld [vmem:[#allocation2 + $0x8] sm:$0xff]  ;;  %v1541_v27 = vld [vmem:[#allocation2 + $0x20] sm:$0xff] }
 0x388   : > { %v2242_v62 = vpop.eup %2241  ;;  %v1525_v53 = vmul.f32 %v2232_v60, %v1509_v36  ;;  %v1511_v55 = vsub.f32 2.0, %v1495_v22  ;;  %v1497_v43 = vmul.f32 %v2240_v59, %v1465_v20  ;;  %v1544_v36 = vld [vmem:[#allocation2 + $0x60] sm:$0xff] }
 0x389   : > { %v2244_v19 = vpop.eup %2243  ;;  %v1524_v4 = vmul.f32 %v2234_v51, %v1508_v21  ;;  %v1510_v26 = vsub.f32 2.0, %v1494_v32  ;;  %v1496_v63 = vmul.f32 %v2242_v62, %v1464_v44  ;;  %v1534_v44 = vld [vmem:[#allocation2 + $0x58] sm:$0xff]  ;;  %v1547_v32 = vld [vmem:[#allocation2 + $0x28] sm:$0xff] }
 0x38a   : > { %1575 = vperm.xlu1 %2214, %v1521_v9   ;;  %v2246_v41 = vpop.eup %2245  ;;  %v1527_v5 = vmul.f32 %v2236_v17, %v1511_v55  ;;  %v1513_v34 = vsub.f32 2.0, %v1497_v43  ;;  %v1499_v13 = vmul.f32 %v2244_v19, %v1467_v52  ;;  %v1542_v17 = vld [vmem:[#allocation2 + $0x10] sm:$0xff] }
 0x38b   : > { %1570 = vperm.xlu0 %2213, %v1520_v37   ;;  %v1526_v38 = vmul.f32 %v2238_v16, %v1510_v26  ;;  %v1512_v56 = vsub.f32 2.0, %v1496_v63  ;;  %v1498_v6 = vmul.f32 %v2246_v41, %v1466_v14 }
 0x38c   : > { %v1529_v49 = vmul.f32 %v2240_v59, %v1513_v34  ;;  %v1515_v35 = vsub.f32 2.0, %v1499_v13 }
 0x38d   : > { %v1528_v39 = vmul.f32 %v2242_v62, %v1512_v56  ;;  %v1514_v20 = vsub.f32 2.0, %v1498_v6  ;;  %v1546_v62 = vld [vmem:[#allocation2 + $0x78] sm:$0xff] }
 0x38e   : > { %1585 = vperm.xlu1 %2214, %v1523_v29   ;;  %v1531_v48 = vmul.f32 %v2244_v19, %v1515_v35  ;;  %v1545_v29 = vld [vmem:[#allocation2 + $0x70] sm:$0xff] }
 0x38f   : > { %1580 = vperm.xlu0 %2213, %v1522_v23   ;;  %v1530_v28 = vmul.f32 %v2246_v41, %v1514_v20 }
 0x392   : > { %1595 = vperm.xlu1 %2214, %v1525_v53  }
 0x393   : > { %1590 = vperm.xlu0 %2213, %v1524_v4  }
 0x396   : > { %1605 = vperm.xlu1 %2214, %v1527_v5  }
 0x397   : > { %1600 = vperm.xlu0 %2213, %v1526_v38  }
 0x39a   : > { %1615 = vperm.xlu1 %2214, %v1529_v49  }
 0x39b   : > { %1610 = vperm.xlu0 %2213, %v1528_v39  }
 0x39e   : > { %1625 = vperm.xlu1 %2214, %v1531_v48  }
 0x39f   : > { %1620 = vperm.xlu0 %2213, %v1530_v28  }
 0x3fd   : > { %v1561_v12 = vpop.permute.xlu1 %1560 }
 0x3fe   : > { %v1630_v57 = vmul.f32 %v1561_v12, %v1534_v44  ;;  %v1551_v50 = vpop.permute.xlu0 %1550 }
 0x3ff   : > { %v1628_v8 = vmul.f32 %v1551_v50, %v1532_v3 }
 0x400   : > { %1646 = vst [vmem:[%s2532_s30 + $0x10] sm:$0xff] %v1630_v57 }
 0x401   : > { %1644 = vst [vmem:[%s2532_s30] sm:$0xff] %v1628_v8  ;;  %v1566_v10 = vpop.permute.xlu1 %1565 }
 0x402   : > { %v1631_v52 = vmul.f32 %v1566_v10, %v1535_v11  ;;  %v1556_v40 = vpop.permute.xlu0 %1555 }
 0x403   : > { %v1629_v45 = vmul.f32 %v1556_v40, %v1533_v47 }
 0x404   : > { %1647 = vst [vmem:[%s2532_s30 + $0x18] sm:$0xff] %v1631_v52 }
 0x405   : > { %1645 = vst [vmem:[%s2532_s30 + $0x8] sm:$0xff] %v1629_v45  ;;  %v1576_v14 = vpop.permute.xlu1 %1575 }
 0x406   : > { %v1633_v18 = vmul.f32 %v1576_v14, %v1537_v33  ;;  %v1571_v58 = vpop.permute.xlu0 %1570 }
 0x407   : > { %v1632_v0 = vmul.f32 %v1571_v58, %v1536_v42 }
 0x408   : > { %1649 = vst [vmem:[%s2532_s30 + $0x28] sm:$0xff] %v1633_v18 }
 0x409   : > { %1648 = vst [vmem:[%s2532_s30 + $0x20] sm:$0xff] %v1632_v0  ;;  %v1586_v31 = vpop.permute.xlu1 %1585 }
 0x40a   : > { %v1635_v1 = vmul.f32 %v1586_v31, %v1539_v54  ;;  %v1581_v30 = vpop.permute.xlu0 %1580 }
 0x40b   : > { %v1634_v60 = vmul.f32 %v1581_v30, %v1538_v24 }
 0x40c   : > { %1651 = vst [vmem:[%s2532_s30 + $0x38] sm:$0xff] %v1635_v1 }
 0x40d   : > { %1650 = vst [vmem:[%s2532_s30 + $0x30] sm:$0xff] %v1634_v60  ;;  %v1596_v7 = vpop.permute.xlu1 %1595 }
 0x40e   : > { %v1637_v51 = vmul.f32 %v1596_v7, %v1541_v27  ;;  %v1591_v9 = vpop.permute.xlu0 %1590 }
 0x40f   : > { %v1636_v46 = vmul.f32 %v1591_v9, %v1540_v2 }
 0x410   : > { %1653 = vst [vmem:[%s2532_s30 + $0x48] sm:$0xff] %v1637_v51 }
 0x411   : > { %1652 = vst [vmem:[%s2532_s30 + $0x40] sm:$0xff] %v1636_v46  ;;  %v1606_v37 = vpop.permute.xlu1 %1605 }
 0x412   : > { %v1639_v15 = vmul.f32 %v1606_v37, %v1543_v25  ;;  %v1601_v61 = vpop.permute.xlu0 %1600 }
 0x413   : > { %v1638_v16 = vmul.f32 %v1601_v61, %v1542_v17 }
 0x414   : > { %1655 = vst [vmem:[%s2532_s30 + $0x58] sm:$0xff] %v1639_v15 }
 0x415   : > { %1654 = vst [vmem:[%s2532_s30 + $0x50] sm:$0xff] %v1638_v16  ;;  %v1616_v22 = vpop.permute.xlu1 %1615 }
 0x416   : > { %v1641_v59 = vmul.f32 %v1616_v22, %v1545_v29  ;;  %v1611_v23 = vpop.permute.xlu0 %1610 }
 0x417   : > { %v1640_v21 = vmul.f32 %v1611_v23, %v1544_v36 }
 0x418   : > { %1657 = vst [vmem:[%s2532_s30 + $0x68] sm:$0xff] %v1641_v59 }
 0x419   : > { %1656 = vst [vmem:[%s2532_s30 + $0x60] sm:$0xff] %v1640_v21  ;;  %v1626_v53 = vpop.permute.xlu1 %1625 }
 0x41a   : > { %v1643_v55 = vmul.f32 %v1626_v53, %v1547_v32  ;;  %v1621_v43 = vpop.permute.xlu0 %1620 }
 0x41b   : > { %v1642_v19 = vmul.f32 %v1621_v43, %v1546_v62 }
 0x41c   : > { %1659 = vst [vmem:[%s2532_s30 + $0x78] sm:$0xff] %v1643_v55 }
 0x41d   : > { %1658 = vst [vmem:[%s2532_s30 + $0x70] sm:$0xff] %v1642_v19 }
 0x41e PF: > { %s1877_s3 = sshll.u32 %s2343_s21, 11  ;;  %s1676_s23 = sshll.u32 %s2532_s30, 4  ;;  %s3022_s23 = int_to_ptr.vmem [resolvable:$true] %s1676_s23 }
 0x41f   : > { %s3019_s22 = scalar_lea.hbm %s3087_s4, %s1877_s3  ;;  %s3105_s27 = sand.u32 1, %s2323_s16  }
 0x420   : > { %s3026_s28 = scalar_lea.sflag [#allocation7], %s3105_s27  ;;  %s2247_s12 = scalar_lea.vmem %s3022_s23, 2048 }
 0x421   : > { %p2248_p8 = scmp.ne.s32.totalorder %s3022_s23, %s2247_s12  ;;  %s2361_s21 = smov [#allocation6]  }
 0x422   : > { %s2251_s13 = sshll.u32 %s2361_s21, 4  ;;  %s2252_s13 = int_to_ptr.vmem [resolvable:$false] %s2251_s13 }
 0x423   : > { %p2249_p9 = pnand %p2248_p8, %p2461_p7  ;;  %s2253_s14 = scalar_lea.vmem %s2252_s13, 4096 }
 0x424   : > { %p2254_p11 = scmp.lt.s32.totalorder %s3022_s23, %s2252_s13  ;;  %p2255_p13 = scmp.lt.s32.totalorder %s2253_s14, %s2247_s12 }
 0x425   : > { %p2250_p10 = pneg %p2249_p9 }
 0x426   : > { %p2256_p0 = por %p2255_p13, %p2254_p11 }
 0x428   : > { %p2257_p1 = pnand %p2256_p0, %p2250_p10 }
 0x42a   : > { %2260 = shalt.err (!%p2257_p1)
}
 0x42b   : > { %s2261_s25 = scalar_lea.hbm %s3019_s22, 2048  ;;  %s2265_s9 = scalar_lea.hbm %s3087_s4, 4096 }
 0x42c   : > { %p2262_p2 = scmp.ne.s32.totalorder %s3019_s22, %s2261_s25  ;;  %p2266_p5 = scmp.lt.s32.totalorder %s3019_s22, %s3087_s4 }
 0x42d   : > { %p2267_p6 = scmp.lt.s32.totalorder %s2265_s9, %s2261_s25 }
 0x42e   : > { %p2263_p3 = pnand %p2262_p2, %p2461_p7 }
 0x42f   : > { %p2268_p8 = por %p2267_p6, %p2266_p5 }
 0x430   : > { %p2264_p4 = pneg %p2263_p3 }
 0x432   : > { %p2269_p9 = pnand %p2268_p8, %p2264_p4 }
 0x434   : > { %2272 = shalt.err (!%p2269_p9)
}
 0x435   : > { %s2362_s18 = smov 128   ;;  %s2363_s5 = smov 8  }
 0x436   : > { %2054 = dma.vmem_to_hbm [thread:$0]  (%p2461_p7), %s3022_s23, 2048, %s3019_s22, %s3026_s28, %s2362_s18, %s2362_s18, %s2363_s5  }
 0x437 PF: > { %p2060_p10 = scmp.ge.s32.totalorder %s2355_s24, 2  ;;  %s1691_s30 = sand.u32 1, %s2319_s15  }
 0x438   : > { %s1692_s3 = scalar_lea.sflag [#allocation7], %s1691_s30 }
 0x439   : > { %p2057_p11 = pnand %p2060_p10, %p2469_p12 }
 0x43b   : > { %p2058_p13 = pneg %p2057_p11 }
 0x43d   : > { %2314 = dma.done.wait (%p2058_p13), %s1692_s3, 2048  }
 0x43e   : > { %2316 = vsyncadd (%p2058_p13), %s1692_s3, 4294965248  ;;  %s17_s24 = sadd.s32 1, %s2355_s24   ;;  %s3106_s18 = sld [smem:[#allocation9_spill]] }
 0x43f   : > { %p14_p0 = scmp.ge.s32.totalorder %s17_s24, 6   ;;  %s3107_s19 = sld [smem:[#allocation14_spill]] }
 0x440   : > { %s3108_s20 = sld [smem:[#allocation10_spill]]  ;;  %s3112_s15 = smov %s2323_s16 }
 0x441   : > { %s3109_s21 = sld [smem:[#allocation11_spill]]  ;;  %s3113_s16 = smov %s2327_s17 }
 0x442   : > { %s3110_s22 = sld [smem:[#allocation12_spill]]  ;;  %s3114_s17 = smov %s2474_s11 }
 0x443   : > { %s3111_s23 = sld [smem:[#allocation13_spill]]  ;;  %16 = sbr.rel (!%p14_p0) target bundleno = 8 (0x8), region = 131 }
 0x448   :  { %1697 = vsyncpa [#allocation7], 1 }
 0x449   :  { %1699 = vsyncpa [#allocation7 + $0x1], 1 }

</bundles_post_ra>
